<compile_context>
chip_gen: v6e
topology: v6e:2x2x1
jax: 0.10.0
libtpu: 0.0.40
codegen_flags: <defaults>
</compile_context>

<pallas_src>
import functools

import jax
import jax.numpy as jnp
from jax import lax
from jax.experimental import pallas as pl
from jax.experimental.pallas import tpu as pltpu

N_IN = 16
N_HID = 64
N_OUT = 3
N_OUT_PAD = 8     # narrow pad: 16x less output HBM traffic than a 128-lane pad
BATCH_ALIGN = 32  # batch-tile alignment valid for f32/bf16/int8 layouts


def mlp_kernel(x_ref, w1_ref, b1_ref, w2_ref, b2_ref, w3_ref, b3_ref, o_ref):
    # In-kernel cast of x to the weight/compute dtype (no wrapper HBM pass).
    x = x_ref[...].astype(w1_ref.dtype)
    # fc1 + relu (f32 MXU accumulation)
    h1 = jnp.dot(x, w1_ref[...],
                 precision=lax.Precision.HIGHEST,
                 preferred_element_type=jnp.float32)
    h1 = jnp.maximum(h1 + b1_ref[...], 0.0)
    # fc2 + relu
    h2 = jnp.dot(h1.astype(w2_ref.dtype), w2_ref[...],
                 precision=lax.Precision.HIGHEST,
                 preferred_element_type=jnp.float32)
    h2 = jnp.maximum(h2 + b2_ref[...], 0.0)
    # fc3 (padded to N_OUT_PAD lanes; extra lanes are zero-weight columns)
    out = jnp.dot(h2.astype(w3_ref.dtype), w3_ref[...],
                  precision=lax.Precision.HIGHEST,
                  preferred_element_type=jnp.float32)
    o_ref[...] = (out + b3_ref[...]).astype(o_ref.dtype)


def prepare_params(params, compute_dtype=jnp.bfloat16):
    """One-time parameter prep: cast weights to compute dtype, keep biases f32
    (added post-MXU), zero-pad fc3 to N_OUT_PAD output lanes."""
    w3 = jnp.zeros((N_HID, N_OUT_PAD), compute_dtype)
    w3 = w3.at[:, :N_OUT].set(params["w3"].astype(compute_dtype))
    b3 = jnp.zeros((1, N_OUT_PAD), jnp.float32)
    b3 = b3.at[:, :N_OUT].set(params["b3"].astype(jnp.float32).reshape(1, N_OUT))
    return {
        "w1": params["w1"].astype(compute_dtype),
        "b1": params["b1"].astype(jnp.float32).reshape(1, N_HID),
        "w2": params["w2"].astype(compute_dtype),
        "b2": params["b2"].astype(jnp.float32).reshape(1, N_HID),
        "w3": w3,
        "b3": b3,
    }


def net_forward(x, prep, *, block_b=2048, out_dtype=None, core_parallel=False):
    """x: (B, 16) float32. prep: output of prepare_params. Returns (B, 3) in
    out_dtype (defaults to the compute dtype of the prepared weights).

    block_b:       batch rows per grid step (rounded to a multiple of 32).
    core_parallel: use pltpu.CORE_PARALLEL on the batch axis (v7x 2-TC shard).
    """
    B, f_in = x.shape
    assert f_in == N_IN
    compute_dtype = prep["w1"].dtype
    if out_dtype is None:
        out_dtype = compute_dtype  # bf16 writeback on the bf16 path

    # Batch tile: multiple of BATCH_ALIGN, no larger than the padded batch.
    tb = min(block_b, pl.cdiv(B, BATCH_ALIGN) * BATCH_ALIGN)
    tb = max(BATCH_ALIGN, pl.cdiv(tb, BATCH_ALIGN) * BATCH_ALIGN)
    b_pad = pl.cdiv(B, tb) * tb

    # Pad the raw f32 input only if needed (single op; no wrapper dtype cast).
    x_in = x if b_pad == B else jnp.pad(x, ((0, b_pad - B), (0, 0)))

    semantics = ((pltpu.CORE_PARALLEL,) if core_parallel else ("parallel",))

    out = pl.pallas_call(
        mlp_kernel,
        out_shape=jax.ShapeDtypeStruct((b_pad, N_OUT_PAD), out_dtype),
        grid=(b_pad // tb,),
        in_specs=[
            # streamed per batch tile
            pl.BlockSpec((tb, N_IN), lambda i: (i, 0)),
            # weights/biases: constant index_maps -> resident in VMEM
            pl.BlockSpec((N_IN, N_HID), lambda i: (0, 0)),
            pl.BlockSpec((1, N_HID), lambda i: (0, 0)),
            pl.BlockSpec((N_HID, N_HID), lambda i: (0, 0)),
            pl.BlockSpec((1, N_HID), lambda i: (0, 0)),
            pl.BlockSpec((N_HID, N_OUT_PAD), lambda i: (0, 0)),
            pl.BlockSpec((1, N_OUT_PAD), lambda i: (0, 0)),
        ],
        out_specs=pl.BlockSpec((tb, N_OUT_PAD), lambda i: (i, 0)),
        compiler_params=pltpu.CompilerParams(dimension_semantics=semantics),
    )(x_in, prep["w1"], prep["b1"], prep["w2"], prep["b2"], prep["w3"], prep["b3"])

    # Small epilogue: slice off padding rows / lanes (downstream code may also
    # consume the padded block directly to skip this pass entirely).
    return out[:B, :N_OUT]


def init_params(key):
    """Deterministic init mimicking nn.Linear default (uniform +/- 1/sqrt(fan_in))."""
    def linear(k, fan_in, fan_out):
        kw, kb = jax.random.split(k)
        bound = 1.0 / jnp.sqrt(fan_in)
        # store weight as (in, out) == W^T relative to PyTorch's (out, in)
        w = jax.random.uniform(kw, (fan_in, fan_out), jnp.float32, -bound, bound)
        b = jax.random.uniform(kb, (1, fan_out), jnp.float32, -bound, bound)
        return w, b

    k1, k2, k3 = jax.random.split(key, 3)
    w1, b1 = linear(k1, N_IN, N_HID)
    w2, b2 = linear(k2, N_HID, N_HID)
    w3, b3 = linear(k3, N_HID, N_OUT)
    return {"w1": w1, "b1": b1, "w2": w2, "b2": b2, "w3": w3, "b3": b3}


def reference_forward(x, p):
    hi = lax.Precision.HIGHEST
    h = jnp.maximum(jnp.dot(x, p["w1"], precision=hi) + p["b1"], 0.0)
    h = jnp.maximum(jnp.dot(h, p["w2"], precision=hi) + p["b2"], 0.0)
    return jnp.dot(h, p["w3"], precision=hi) + p["b3"]


if __name__ == "__main__":
    key = jax.random.PRNGKey(0)
    kp, kx = jax.random.split(key)
    params = init_params(kp)

    # Small deterministic test batch. B=200 is not a tile multiple, so this
    # exercises padding + a multi-step batch grid when block_b=64.
    B = 200
    x = jax.random.normal(kx, (B, N_IN), jnp.float32)
    ref = reference_forward(x, params)

    # --- Exact f32 path: multi-tile grid (tb=64 -> grid=(4,)), tight check ---
    prep_f32 = prepare_params(params, compute_dtype=jnp.float32)
    fwd_f32 = jax.jit(functools.partial(net_forward, block_b=64))
    out_f32 = fwd_f32(x, prep_f32)
    jax.block_until_ready(out_f32)
    assert out_f32.shape == (B, N_OUT)
    assert out_f32.dtype == jnp.float32
    assert jnp.allclose(out_f32, ref, atol=1e-5, rtol=1e-5)

    # --- bf16 fast path (all generations): big tile, bf16 in/out, relaxed tol ---
    prep_bf16 = prepare_params(params, compute_dtype=jnp.bfloat16)
    fwd_bf16 = jax.jit(functools.partial(net_forward, block_b=2048))
    out_bf16 = fwd_bf16(x, prep_bf16)
    jax.block_until_ready(out_bf16)
    assert out_bf16.shape == (B, N_OUT)
    assert out_bf16.dtype == jnp.bfloat16
    assert jnp.allclose(out_bf16.astype(jnp.float32), ref, atol=5e-2, rtol=5e-2)

    print("KERNEL_OK")
</pallas_src>

<mosaic_0001>
module attributes {stable_mosaic.version = 11 : i64} {
  func.func @mlp_kernel(%arg0: i32, %arg1: memref<64x16xf32, #tpu.memory_space<vmem>>, %arg2: memref<16x64xf32, #tpu.memory_space<vmem>>, %arg3: memref<1x64xf32, #tpu.memory_space<vmem>>, %arg4: memref<64x64xf32, #tpu.memory_space<vmem>>, %arg5: memref<1x64xf32, #tpu.memory_space<vmem>>, %arg6: memref<64x8xf32, #tpu.memory_space<vmem>>, %arg7: memref<1x8xf32, #tpu.memory_space<vmem>>, %arg8: memref<64x8xf32, #tpu.memory_space<vmem>>) attributes {dimension_semantics = [#tpu.dimension_semantics<parallel>], iteration_bounds = array<i64: 4>, scalar_prefetch = 0 : i64, scratch_operands = 0 : i64, tpu.core_type = #tpu.core_type<tc>, window_params = [{transform_indices = @transform_0, window_bounds = array<i64: 64, 16>}, {pipeline_mode = #tpu.pipeline_mode<synchronous>, transform_indices = @transform_1, window_bounds = array<i64: 16, 64>}, {pipeline_mode = #tpu.pipeline_mode<synchronous>, transform_indices = @transform_2, window_bounds = array<i64: 1, 64>}, {pipeline_mode = #tpu.pipeline_mode<synchronous>, transform_indices = @transform_3, window_bounds = array<i64: 64, 64>}, {pipeline_mode = #tpu.pipeline_mode<synchronous>, transform_indices = @transform_4, window_bounds = array<i64: 1, 64>}, {pipeline_mode = #tpu.pipeline_mode<synchronous>, transform_indices = @transform_5, window_bounds = array<i64: 64, 8>}, {pipeline_mode = #tpu.pipeline_mode<synchronous>, transform_indices = @transform_6, window_bounds = array<i64: 1, 8>}, {transform_indices = @transform_7, window_bounds = array<i64: 64, 8>}]} {
    %c0 = arith.constant 0 : index
    %c0_0 = arith.constant 0 : index
    %0 = vector.load %arg1[%c0, %c0_0] : memref<64x16xf32, #tpu.memory_space<vmem>>, vector<64x16xf32>
    %c0_1 = arith.constant 0 : index
    %c0_2 = arith.constant 0 : index
    %1 = vector.load %arg2[%c0_1, %c0_2] : memref<16x64xf32, #tpu.memory_space<vmem>>, vector<16x64xf32>
    %cst = arith.constant dense<0.000000e+00> : vector<64x64xf32>
    %2 = tpu.matmul %0, %1, %cst {dimension_numbers = #tpu.dot_dimension_numbers<[1], [0], [0], [1], [0, 0, 1, 1], [], []>, precision = #tpu.contract_precision<fp32>} : vector<64x16xf32>, vector<16x64xf32>, vector<64x64xf32> -> vector<64x64xf32>
    %c0_3 = arith.constant 0 : index
    %c0_4 = arith.constant 0 : index
    %3 = vector.load %arg3[%c0_3, %c0_4] : memref<1x64xf32, #tpu.memory_space<vmem>>, vector<1x64xf32>
    %4 = vector.broadcast %3 : vector<1x64xf32> to vector<64x64xf32>
    %5 = arith.addf %2, %4 : vector<64x64xf32>
    %cst_5 = arith.constant 0.000000e+00 : f32
    %6 = vector.broadcast %cst_5 : f32 to vector<64x64xf32>
    %7 = arith.maximumf %5, %6 : vector<64x64xf32>
    %c0_6 = arith.constant 0 : index
    %c0_7 = arith.constant 0 : index
    %8 = vector.load %arg4[%c0_6, %c0_7] : memref<64x64xf32, #tpu.memory_space<vmem>>, vector<64x64xf32>
    %cst_8 = arith.constant dense<0.000000e+00> : vector<64x64xf32>
    %9 = tpu.matmul %7, %8, %cst_8 {dimension_numbers = #tpu.dot_dimension_numbers<[1], [0], [0], [1], [0, 0, 1, 1], [], []>, precision = #tpu.contract_precision<fp32>} : vector<64x64xf32>, vector<64x64xf32>, vector<64x64xf32> -> vector<64x64xf32>
    %c0_9 = arith.constant 0 : index
    %c0_10 = arith.constant 0 : index
    %10 = vector.load %arg5[%c0_9, %c0_10] : memref<1x64xf32, #tpu.memory_space<vmem>>, vector<1x64xf32>
    %11 = vector.broadcast %10 : vector<1x64xf32> to vector<64x64xf32>
    %12 = arith.addf %9, %11 : vector<64x64xf32>
    %cst_11 = arith.constant 0.000000e+00 : f32
    %13 = vector.broadcast %cst_11 : f32 to vector<64x64xf32>
    %14 = arith.maximumf %12, %13 : vector<64x64xf32>
    %c0_12 = arith.constant 0 : index
    %c0_13 = arith.constant 0 : index
    %15 = vector.load %arg6[%c0_12, %c0_13] : memref<64x8xf32, #tpu.memory_space<vmem>>, vector<64x8xf32>
    %cst_14 = arith.constant dense<0.000000e+00> : vector<64x8xf32>
    %16 = tpu.matmul %14, %15, %cst_14 {dimension_numbers = #tpu.dot_dimension_numbers<[1], [0], [0], [1], [0, 0, 1, 1], [], []>, precision = #tpu.contract_precision<fp32>} : vector<64x64xf32>, vector<64x8xf32>, vector<64x8xf32> -> vector<64x8xf32>
    %c0_15 = arith.constant 0 : index
    %c0_16 = arith.constant 0 : index
    %17 = vector.load %arg7[%c0_15, %c0_16] : memref<1x8xf32, #tpu.memory_space<vmem>>, vector<1x8xf32>
    %18 = vector.broadcast %17 : vector<1x8xf32> to vector<64x8xf32>
    %19 = arith.addf %16, %18 : vector<64x8xf32>
    %c0_17 = arith.constant 0 : index
    %c0_18 = arith.constant 0 : index
    %20 = vector.load %arg8[%c0_17, %c0_18] : memref<64x8xf32, #tpu.memory_space<vmem>>, vector<64x8xf32>
    tpu.vector_store %arg8[%c0_17, %c0_18], %19 {strides = array<i32>} : memref<64x8xf32, #tpu.memory_space<vmem>>, vector<64x8xf32>,
    return
  }
  func.func @transform_0(%arg0: i32) -> (i32, i32) {
    %c0_i32 = arith.constant 0 : i32
    %c0_i32_0 = arith.constant 0 : i32
    return %arg0, %c0_i32 : i32, i32
  }
  func.func @transform_1(%arg0: i32) -> (i32, i32) {
    %c0_i32 = arith.constant 0 : i32
    %c0_i32_0 = arith.constant 0 : i32
    %c0_i32_1 = arith.constant 0 : i32
    return %c0_i32, %c0_i32_0 : i32, i32
  }
  func.func @transform_2(%arg0: i32) -> (i32, i32) {
    %c0_i32 = arith.constant 0 : i32
    %c0_i32_0 = arith.constant 0 : i32
    %c0_i32_1 = arith.constant 0 : i32
    return %c0_i32, %c0_i32_0 : i32, i32
  }
  func.func @transform_3(%arg0: i32) -> (i32, i32) {
    %c0_i32 = arith.constant 0 : i32
    %c0_i32_0 = arith.constant 0 : i32
    %c0_i32_1 = arith.constant 0 : i32
    return %c0_i32, %c0_i32_0 : i32, i32
  }
  func.func @transform_4(%arg0: i32) -> (i32, i32) {
    %c0_i32 = arith.constant 0 : i32
    %c0_i32_0 = arith.constant 0 : i32
    %c0_i32_1 = arith.constant 0 : i32
    return %c0_i32, %c0_i32_0 : i32, i32
  }
  func.func @transform_5(%arg0: i32) -> (i32, i32) {
    %c0_i32 = arith.constant 0 : i32
    %c0_i32_0 = arith.constant 0 : i32
    %c0_i32_1 = arith.constant 0 : i32
    return %c0_i32, %c0_i32_0 : i32, i32
  }
  func.func @transform_6(%arg0: i32) -> (i32, i32) {
    %c0_i32 = arith.constant 0 : i32
    %c0_i32_0 = arith.constant 0 : i32
    %c0_i32_1 = arith.constant 0 : i32
    return %c0_i32, %c0_i32_0 : i32, i32
  }
  func.func @transform_7(%arg0: i32) -> (i32, i32) {
    %c0_i32 = arith.constant 0 : i32
    %c0_i32_0 = arith.constant 0 : i32
    return %arg0, %c0_i32 : i32, i32
  }
}

</mosaic_0001>

<bundles_post_ra>
// kernel: net_forward.1
= control target key start
LH: loop header
LB: loop body
LE: loop exit
PB: predicated region body
PF: predicated region fallthrough
CT: control target
= control target key end

     0   :  { %s3674_s24 = smov 0   ;;  %s4462_s0 = inlined_call_operand.vmem [shape: f32[256,16], index: 0, kind: input, shape index: {}]   ;;  %s4463_s1 = inlined_call_operand.vmem [shape: f32[16,64], index: 1, kind: input, shape index: {}]   ;;  %s4464_s2 = inlined_call_operand.vmem [shape: f32[1,64], index: 2, kind: input, shape index: {}]   ;;  %s4465_s3 = inlined_call_operand.vmem [shape: f32[64,64], index: 3, kind: input, shape index: {}]   ;;  %s4466_s4 = inlined_call_operand.vmem [shape: f32[1,64], index: 4, kind: input, shape index: {}]   ;;  %s4467_s5 = inlined_call_operand.vmem [shape: f32[64,8], index: 5, kind: input, shape index: {}]   ;;  %s4468_s6 = inlined_call_operand.vmem [shape: f32[1,8], index: 6, kind: input, shape index: {}]   ;;  %s4469_s7 = inlined_call_operand.vmem [shape: f32[256,8], index: 7, kind: output, shape index: {}]  }
   0x1 LB: > { %s2920_s25 = sadd.s32 4294967295, %s3632_s24   ;;  %p2924_p0 = scmp.ge.s32.totalorder %s3632_s24, 1  ;;  %s3632_s24 = sphi %s3674_s24, %s17_s24  }
   0x2   : > { %p238_p1 = scmp.lt.s32.totalorder %s3632_s24, 5 }
   0x4   : > { %p239_p2 = pnand %p2924_p0, %p238_p1 }
   0x6   : > { %242 = sbr.rel (%p239_p2) target bundleno = 788 (0x314), region = 48 }
   0xb   : > { %v291_v0 = vld [vmem:[%s4463_s1 + $0x8] sm:$0xff]  ;;  %v290_v1 = vld [vmem:[%s4463_s1] sm:$0xff]  ;;  %s2925_s30 = sshll.u32 %s2920_s25, 3  ;;  %vm299_vm0 = vcmask 130048   ;;  %vm1107_vm1 = vcmask 523264   ;;  %vm2855_vm2 = vcmask 64512  }
   0xc   : > { %v3688_v2 = vand.u32 4294901760, %v291_v0  ;;  %v3690_v3 = vand.u32 4294901760, %v290_v1  ;;  %p271_p3 = scmp.lt.s32.totalorder %s2925_s30, 31 }
   0xe   : > { %3186 = vmatprep.subr.mxu0 %v3688_v2  ;;  %v3694_v4 = vsub.f32 %v291_v0, %v3688_v2  ;;  %v3697_v5 = vsub.f32 %v290_v1, %v3690_v3  ;;  %s4555_s30 = smov (!%p271_p3, %s2925_s30), 31 }
   0xf   : > { %3187 = vmatpush3.msra.mxu0 %v3688_v2  ;;  %s2926_s8 = sshll.u32 %s4555_s30, 3 }
  0x10   : > { %v3703_v6 = vand.u32 4294901760, %v3694_v4  ;;  %3188 = vmatprep.subr.mxu0 %v3690_v3  ;;  %v3707_v7 = vand.u32 4294901760, %v3697_v5  ;;  %s274_s11 = scalar_lea.vmem %s4462_s0, %s2926_s8  ;;  %s4437_s12 = scalar_lea.vmem %s4469_s7, %s2926_s8 }
  0x11   : > { %3189 = vmatpush3.msra.mxu0 %v3690_v3  ;;  %v282_v10 = vld [vmem:[%s274_s11] sm:$0xff]  ;;  %v283_v11 = vld [vmem:[%s274_s11 + $0x8] sm:$0xff]  ;;  %v284_v12 = vld [vmem:[%s274_s11 + $0x10] sm:$0xff] }
  0x12   : > { %v503_v8 = vsub.f32 %v3694_v4, %v3703_v6  ;;  %v510_v9 = vsub.f32 %v3697_v5, %v3707_v7  ;;  %3218 = vmatprep.subr.mxu0 %v3694_v4  ;;  %v301_v13 = vsel %vm299_vm0, %v282_v10, 0  ;;  %v304_v14 = vsel %vm299_vm0, %v283_v11, 0  ;;  %v285_v16 = vld [vmem:[%s274_s11 + $0x18] sm:$0xff]  ;;  %v286_v17 = vld [vmem:[%s274_s11 + $0x20] sm:$0xff]  ;;  %v287_v18 = vld [vmem:[%s274_s11 + $0x28] sm:$0xff] }
  0x13   : > { %v307_v15 = vsel %vm299_vm0, %v284_v12, 0  ;;  %v3724_v21 = vand.u32 4294901760, %v301_v13  ;;  %v3726_v22 = vand.u32 4294901760, %v304_v14  ;;  %v288_v23 = vld [vmem:[%s274_s11 + $0x30] sm:$0xff]  ;;  %v289_v24 = vld [vmem:[%s274_s11 + $0x38] sm:$0xff]  ;;  %v310_v26 = vsel %vm299_vm0, %v285_v16, 0 }
  0x14   : > { %v504_v19 = vand.u32 4294901760, %v503_v8  ;;  %v511_v20 = vand.u32 4294901760, %v510_v9  ;;  %v3728_v25 = vand.u32 4294901760, %v307_v15  ;;  %v313_v27 = vsel %vm299_vm0, %v286_v17, 0  ;;  %v1097_v9 = vld [vmem:[%s4465_s3 + $0x28] sm:$0xff] }
  0x15   : > { %v316_v28 = vsel %vm299_vm0, %v287_v18, 0  ;;  %v3734_v29 = vsub.f32 %v301_v13, %v3724_v21  ;;  %3206 = vmatprep.mubr.f32.mxu1 %v3724_v21  ;;  %v3738_v30 = vsub.f32 %v304_v14, %v3726_v22  ;;  %v3740_v31 = vand.u32 4294901760, %v310_v26  ;;  %v1096_v13 = vld [vmem:[%s4465_s3 + $0x20] sm:$0xff]  ;;  %v1095_v18 = vld [vmem:[%s4465_s3 + $0x18] sm:$0xff] }
  0x16   : > { %3202 = vmatprep.subr.mxu1 %v504_v19  ;;  %v3742_v32 = vand.u32 4294901760, %v313_v27  ;;  %v3745_v33 = vsub.f32 %v307_v15, %v3728_v25  ;;  %v3747_v34 = vand.u32 4294901760, %v316_v28  ;;  %v319_v35 = vsel %vm299_vm0, %v288_v23, 0 }
  0x17   : > { %3203 = vmatpush3.msra.mxu1 %v504_v19  ;;  %v322_v36 = vsel %vm299_vm0, %v289_v24, 0  ;;  %v393_v37 = vand.u32 4294901760, %v3734_v29  ;;  %v403_v38 = vand.u32 4294901760, %v3738_v30  ;;  %v3754_v39 = vsub.f32 %v310_v26, %v3740_v31  ;;  %v1094_v24 = vld [vmem:[%s4465_s3 + $0x10] sm:$0xff] }
  0x18   : > { %3204 = vmatprep.subr.mxu1 %v511_v20  ;;  %v3757_v40 = vsub.f32 %v313_v27, %v3742_v32  ;;  %v413_v41 = vand.u32 4294901760, %v3745_v33  ;;  %v3761_v42 = vsub.f32 %v316_v28, %v3747_v34  ;;  %v3763_v43 = vand.u32 4294901760, %v319_v35 }
  0x19   : > { %3205 = vmatpush3.msra.mxu1 %v511_v20  ;;  %v3765_v44 = vand.u32 4294901760, %v322_v36  ;;  %v394_v45 = vsub.f32 %v3734_v29, %v393_v37  ;;  %v404_v46 = vsub.f32 %v3738_v30, %v403_v38  ;;  %v423_v47 = vand.u32 4294901760, %v3754_v39 }
  0x1a   : > { %3207 = vmatmul.mubr.f32.vlgmr.msra.gmra.mxu1 %v3726_v22  ;;  %3234 = vmatprep.subr.mxu1 %v3688_v2  ;;  %v433_v48 = vand.u32 4294901760, %v3757_v40  ;;  %v414_v49 = vsub.f32 %v3745_v33, %v413_v41  ;;  %v443_v50 = vand.u32 4294901760, %v3761_v42  ;;  %v452_v51 = vsub.f32 %v319_v35, %v3763_v43 }
  0x1b   : > { %3235 = vmatpush3.msra.mxu1 %v3688_v2  ;;  %3209 = vmatprep.mubr.f32.mxu1 %v3728_v25  ;;  %v462_v52 = vsub.f32 %v322_v36, %v3765_v44  ;;  %v395_v53 = vand.u32 4294901760, %v394_v45  ;;  %v405_v54 = vand.u32 4294901760, %v404_v46  ;;  %v424_v55 = vsub.f32 %v3754_v39, %v423_v47  ;;  %v1092_v36 = vld [vmem:[%s4465_s3] sm:$0xff] }
  0x1c   : > { %v434_v56 = vsub.f32 %v3757_v40, %v433_v48  ;;  %3236 = vmatprep.subr.mxu1 %v3690_v3  ;;  %v415_v57 = vand.u32 4294901760, %v414_v49  ;;  %v453_v58 = vand.u32 4294901760, %v452_v51  ;;  %v444_v60 = vsub.f32 %v3761_v42, %v443_v50 }
  0x1d   : > { %3237 = vmatpush3.msra.mxu1 %v3690_v3  ;;  %3190 = vmatprep.mubr.f32.mxu0 %v395_v53  ;;  %v425_v59 = vand.u32 4294901760, %v424_v55  ;;  %v463_v61 = vand.u32 4294901760, %v462_v52  ;;  %v3846_v12 = vand.u32 4294901760, %v1097_v9  ;;  %v3861_v17 = vand.u32 4294901760, %v1096_v13 }
  0x1e   : > { %3210 = vmatmul.mubr.f32.gmra.mxu1 %v3740_v31  ;;  %3191 = vmatmul.mubr.f32.vlgmr.msra.gmra.mxu0 %v405_v54  ;;  %v435_v62 = vand.u32 4294901760, %v434_v56  ;;  %v454_v63 = vsub.f32 %v452_v51, %v453_v58  ;;  %v445_v0 = vand.u32 4294901760, %v444_v60  ;;  %v3877_v23 = vand.u32 4294901760, %v1095_v18 }
  0x1f   : > { %3212 = vmatprep.mubr.f32.mxu1 %v3742_v32  ;;  %3219 = vmatpush3.msra.mxu0 %v3694_v4  ;;  %v464_v1 = vsub.f32 %v462_v52, %v463_v61  ;;  %v3859_v16 = vsub.f32 %v1097_v9, %v3846_v12  ;;  %v3888_v28 = vand.u32 4294901760, %v1094_v24 }
  0x20   : > { %3193 = vmatprep.mubr.f32.mxu0 %v415_v57  ;;  %3220 = vmatprep.subr.mxu0 %v3697_v5  ;;  %v455_v8 = vand.u32 4294901760, %v454_v63 }
  0x21   : > { %3266 = vmatprep.subr.mxu1 %v3688_v2  ;;  %3221 = vmatpush3.msra.mxu0 %v3697_v5  ;;  %v465_v4 = vand.u32 4294901760, %v464_v1  ;;  %v1098_v5 = vld [vmem:[%s4465_s3 + $0x30] sm:$0xff] }
  0x22   : > { %3213 = vmatmul.mubr.f32.gmra.mxu1 %v3747_v34  ;;  %3194 = vmatmul.mubr.f32.gmra.mxu0 %v425_v59 }
  0x23   : > { %3215 = vmatprep.mubr.f32.mxu1 %v3763_v43  ;;  %3196 = vmatprep.mubr.f32.mxu0 %v435_v62 }
  0x24   : > { %3250 = vmatprep.subr.mxu0 %v3703_v6 }
  0x26   : > { %3216 = vmatmul.mubr.f32.gmra.mxu1 %v3765_v44  ;;  %3197 = vmatmul.mubr.f32.gmra.mxu0 %v445_v0 }
  0x27   : > { %3238 = vmatprep.mubr.f32.mxu1 %v393_v37  ;;  %3199 = vmatprep.mubr.f32.mxu0 %v455_v8 }
  0x2a   : > { %3239 = vmatmul.mubr.f32.vlgmr.msra.gmra.mxu1 %v403_v38  ;;  %3200 = vmatmul.mubr.f32.gmra.mxu0 %v465_v4 }
  0x2b   : > { %3267 = vmatpush3.msra.mxu1 %v3688_v2  ;;  %3222 = vmatprep.mubr.f32.mxu0 %v3734_v29  ;;  %v1099_v2 = vld [vmem:[%s4465_s3 + $0x38] sm:$0xff]  ;;  %v3891_v29 = vsub.f32 %v1095_v18, %v3877_v23  ;;  %v2929_v18 = vld [vmem:[%s4464_s2] ss:$0 sm:$0xff] }
  0x2c   : > { %3241 = vmatprep.mubr.f32.mxu1 %v413_v41  ;;  %3268 = vmatprep.subr.mxu1 %v3690_v3 }
  0x2d   : > { %3269 = vmatpush3.msra.mxu1 %v3690_v3  ;;  %v3825_v3 = vand.u32 4294901760, %v1099_v2  ;;  %v3906_v35 = vand.u32 4294901760, %v3891_v29 }
  0x2e   : > { %3242 = vmatmul.mubr.f32.gmra.mxu1 %v423_v47  ;;  %3223 = vmatmul.mubr.f32.vlgmr.msra.gmra.mxu0 %v3738_v30  ;;  %v1093_v30 = vld [vmem:[%s4465_s3 + $0x8] sm:$0xff] }
  0x2f   : > { %3244 = vmatprep.mubr.f32.mxu1 %v433_v48  ;;  %3251 = vmatpush3.msra.mxu0 %v3703_v6  ;;  %v3831_v6 = vsub.f32 %v1099_v2, %v3825_v3  ;;  %4516 = vst [vmem:[#allocation6_spill] sm:$0xff] %v3906_v35  ;;  %v1333_v41 = vsub.f32 %v3891_v29, %v3906_v35 }
  0x30   : > { %3225 = vmatprep.mubr.f32.mxu0 %v3745_v33  ;;  %3252 = vmatprep.subr.mxu0 %v3707_v7  ;;  %v3900_v33 = vsub.f32 %v1094_v24, %v3888_v28 }
  0x31   : > { %3253 = vmatpush3.msra.mxu0 %v3707_v7  ;;  %v3833_v7 = vand.u32 4294901760, %v1098_v5  ;;  %v3841_v10 = vand.u32 4294901760, %v3831_v6  ;;  %v1334_v45 = vand.u32 4294901760, %v1333_v41 }
  0x32   : > { %3245 = vmatmul.mubr.f32.gmra.mxu1 %v443_v50  ;;  %3226 = vmatmul.mubr.f32.gmra.mxu0 %v3754_v39  ;;  %v3913_v38 = vand.u32 4294901760, %v3900_v33 }
  0x33   : > { %3247 = vmatprep.mubr.f32.mxu1 %v453_v58  ;;  %3228 = vmatprep.mubr.f32.mxu0 %v3757_v40  ;;  %4512 = vst [vmem:[#allocation2_spill] sm:$0xff] %v3841_v10  ;;  %v3844_v11 = vsub.f32 %v1098_v5, %v3833_v7  ;;  %v1305_v14 = vsub.f32 %v3831_v6, %v3841_v10  ;;  %v3918_v40 = vand.u32 4294901760, %v1092_v36 }
  0x34   : > { %3282 = vmatprep.subr.mxu0 %v3825_v3  ;;  %4517 = vst [vmem:[#allocation7_spill] sm:$0xff] %v3913_v38 }
  0x35   : > { %v3856_v15 = vand.u32 4294901760, %v3844_v11  ;;  %v1306_v19 = vand.u32 4294901760, %v1305_v14 }
  0x36   : > { %3248 = vmatmul.mubr.f32.gmra.mxu1 %v463_v61  ;;  %3229 = vmatmul.mubr.f32.gmra.mxu0 %v3761_v42  ;;  %v1340_v42 = vsub.f32 %v3900_v33, %v3913_v38 }
  0x37   : > { %3270 = vmatprep.mubr.f32.mxu1 %v3724_v21  ;;  %3231 = vmatprep.mubr.f32.mxu0 %v452_v51  ;;  %4513 = vst [vmem:[#allocation3_spill] sm:$0xff] %v3856_v15  ;;  %v1312_v20 = vsub.f32 %v3844_v11, %v3856_v15 }
  0x38   : > { %3310 = vmatprep.subr.mxu1 %v1306_v19  ;;  %v1341_v46 = vand.u32 4294901760, %v1340_v42 }
  0x3a   : > { %3271 = vmatmul.mubr.f32.vlgmr.msra.gmra.mxu1 %v3726_v22  ;;  %3232 = vmatmul.mubr.f32.gmra.mxu0 %v462_v52 }
  0x3b   : > { %3273 = vmatprep.mubr.f32.mxu1 %v3728_v25  ;;  %3254 = vmatprep.mubr.f32.mxu0 %v3724_v21  ;;  %v3871_v21 = vand.u32 4294901760, %v3859_v16 }
  0x3c   : > { %3311 = vmatpush3.msra.mxu1 %v1306_v19 }
  0x3d   : > { %4514 = vst [vmem:[#allocation4_spill] sm:$0xff] %v3871_v21  ;;  %v1319_v26 = vsub.f32 %v3859_v16, %v3871_v21 }
  0x3e   : > { %3274 = vmatmul.mubr.f32.gmra.mxu1 %v3740_v31  ;;  %3255 = vmatmul.mubr.f32.vlgmr.msra.gmra.mxu0 %v3726_v22  ;;  %v3874_v22 = vsub.f32 %v1096_v13, %v3861_v17 }
  0x3f   : > { %3276 = vmatprep.mubr.f32.mxu1 %v3742_v32  ;;  %3257 = vmatprep.mubr.f32.mxu0 %v3728_v25  ;;  %v1313_v25 = vand.u32 4294901760, %v1312_v20 }
  0x40   : > { %3283 = vmatpush3.msra.mxu0 %v3825_v3  ;;  %v3886_v27 = vand.u32 4294901760, %v3874_v22 }
  0x41   : > { %3284 = vmatprep.subr.mxu0 %v3833_v7  ;;  %3312 = vmatprep.subr.mxu1 %v1313_v25 }
  0x42   : > { %3277 = vmatmul.mubr.f32.gmra.mxu1 %v3747_v34  ;;  %3258 = vmatmul.mubr.f32.gmra.mxu0 %v3740_v31  ;;  %4515 = vst [vmem:[#allocation5_spill] sm:$0xff] %v3886_v27  ;;  %v1320_v31 = vand.u32 4294901760, %v1319_v26 }
  0x43   : > { %3279 = vmatprep.mubr.f32.mxu1 %v3763_v43  ;;  %3260 = vmatprep.mubr.f32.mxu0 %v3742_v32  ;;  %v1326_v32 = vsub.f32 %v3874_v22, %v3886_v27 }
  0x44   : > { %3285 = vmatpush3.msra.mxu0 %v3833_v7  ;;  %3313 = vmatpush3.msra.mxu1 %v1313_v25 }
  0x45   : > { %3286 = vmatprep.subr.mxu0 %v3846_v12  ;;  %3314 = vmatprep.subr.mxu1 %v1320_v31  ;;  %v1327_v37 = vand.u32 4294901760, %v1326_v32 }
  0x46   : > { %3280 = vmatmul.mubr.f32.gmra.mxu1 %v3765_v44  ;;  %3261 = vmatmul.mubr.f32.gmra.mxu0 %v3747_v34  ;;  %v3902_v34 = vand.u32 4294901760, %v1093_v30 }
  0x47   : > { %3263 = vmatprep.mubr.f32.mxu0 %v3763_v43  ;;  %3287 = vmatpush3.msra.mxu0 %v3846_v12 }
  0x48   : > { %3288 = vmatprep.subr.mxu0 %v3861_v17  ;;  %v3916_v39 = vsub.f32 %v1093_v30, %v3902_v34  ;;  %3315 = vmatpush3.msra.mxu1 %v1320_v31 }
  0x49   : > { %3289 = vmatpush3.msra.mxu0 %v3861_v17  ;;  %3316 = vmatprep.subr.mxu1 %v1327_v37 }
  0x4a   : > { %3264 = vmatmul.mubr.f32.gmra.mxu0 %v3765_v44  ;;  %3290 = vmatprep.subr.mxu0 %v3877_v23  ;;  %4518 = vst [vmem:[#allocation8_spill] sm:$0xff] %v3916_v39  ;;  %v3927_v43 = vand.u32 4294901760, %v3916_v39  ;;  %v3930_v44 = vsub.f32 %v1092_v36, %v3918_v40 }
  0x4b   : > { %3291 = vmatpush3.msra.mxu0 %v3877_v23  ;;  %3317 = vmatpush3.msra.mxu1 %v1327_v37 }
  0x4c   : > { %3292 = vmatprep.subr.mxu0 %v3888_v28  ;;  %4519 = vst [vmem:[#allocation9_spill] sm:$0xff] %v3927_v43  ;;  %4520 = vst [vmem:[#allocation10_spill] sm:$0xff] %v3930_v44  ;;  %v1347_v47 = vsub.f32 %v3916_v39, %v3927_v43  ;;  %v3937_v48 = vand.u32 4294901760, %v3930_v44  ;;  %3318 = vmatprep.subr.mxu1 %v1334_v45 }
  0x4d   : > { %3293 = vmatpush3.msra.mxu0 %v3888_v28  ;;  %3319 = vmatpush3.msra.mxu1 %v1334_v45 }
  0x4e   : > { %3294 = vmatprep.subr.mxu0 %v3902_v34  ;;  %4521 = vst [vmem:[#allocation11_spill] sm:$0xff] %v3937_v48  ;;  %v1348_v49 = vand.u32 4294901760, %v1347_v47  ;;  %v1354_v50 = vsub.f32 %v3930_v44, %v3937_v48  ;;  %3320 = vmatprep.subr.mxu1 %v1341_v46 }
  0x4f   : > { %3295 = vmatpush3.msra.mxu0 %v3902_v34  ;;  %3321 = vmatpush3.msra.mxu1 %v1341_v46 }
  0x50   : > { %3296 = vmatprep.subr.mxu0 %v3918_v40  ;;  %v1355_v51 = vand.u32 4294901760, %v1354_v50  ;;  %3322 = vmatprep.subr.mxu1 %v1348_v49 }
  0x51   : > { %3297 = vmatpush3.msra.mxu0 %v3918_v40  ;;  %3323 = vmatpush3.msra.mxu1 %v1348_v49 }
  0x52   : > { %3338 = vmatprep.subr.mxu0 %v3831_v6  ;;  %3324 = vmatprep.subr.mxu1 %v1355_v51 }
  0x53   : > { %3325 = vmatpush3.msra.mxu1 %v1355_v51 }
  0x54   : > { %3366 = vmatprep.subr.mxu1 %v3825_v3 }
  0xda   : > { %v3208_v52 = vpop.f32.mrf.mxu1 }
  0xdc   : > { %v548_v53 = vpop.f32.mrf.mxu1 }
  0xde   : > { %v3211_v54 = vpop.f32.mrf.mxu1  ;;  %v3192_v55 = vpop.f32.mrf.mxu0 }
  0xdf   : > { %v408_v25 = vadd.f32 %v3192_v55, %v2929_v18 }
  0xe0   : > { %v560_v56 = vpop.f32.mrf.mxu1  ;;  %v397_v57 = vpop.f32.mrf.mxu0 }
  0xe1   : > { %v398_v31 = vadd.f32 %v2929_v18, %v397_v57  ;;  %v555_v37 = vadd.f32 %v3208_v52, %v408_v25 }
  0xe2   : > { %v3214_v58 = vpop.f32.mrf.mxu1  ;;  %v3195_v59 = vpop.f32.mrf.mxu0 }
  0xe3   : > { %v428_v41 = vadd.f32 %v3195_v59, %v2929_v18  ;;  %v549_v46 = vadd.f32 %v548_v53, %v398_v31 }
  0xe4   : > { %v572_v60 = vpop.f32.mrf.mxu1  ;;  %v417_v61 = vpop.f32.mrf.mxu0 }
  0xe5   : > { %v418_v47 = vadd.f32 %v2929_v18, %v417_v61  ;;  %v567_v43 = vadd.f32 %v3211_v54, %v428_v41 }
  0xe6   : > { %v3217_v62 = vpop.f32.mrf.mxu1  ;;  %v3198_v63 = vpop.f32.mrf.mxu0 }
  0xe7   : > { %v448_v51 = vadd.f32 %v3198_v63, %v2929_v18  ;;  %v561_v21 = vadd.f32 %v560_v56, %v418_v47 }
  0xe8   : > { %v584_v0 = vpop.f32.mrf.mxu1  ;;  %v437_v1 = vpop.f32.mrf.mxu0 }
  0xe9   : > { %v438_v55 = vadd.f32 %v2929_v18, %v437_v1  ;;  %v579_v52 = vadd.f32 %v3214_v58, %v448_v51 }
  0xea   : > { %v3240_v8 = vpop.f32.mrf.mxu1  ;;  %v3201_v4 = vpop.f32.mrf.mxu0 }
  0xeb   : > { %v468_v59 = vadd.f32 %v3201_v4, %v2929_v18 }
  0xec   : > { %v790_v2 = vpop.f32.mrf.mxu1  ;;  %v457_v5 = vpop.f32.mrf.mxu0 }
  0xed   : > { %v458_v31 = vadd.f32 %v2929_v18, %v457_v5  ;;  %v591_v1 = vadd.f32 %v3217_v62, %v468_v59 }
  0xee   : > { %v3243_v9 = vpop.f32.mrf.mxu1  ;;  %v3224_v13 = vpop.f32.mrf.mxu0 }
  0xef   : > { %v674_v49 = vadd.f32 %v3224_v13, %v555_v37  ;;  %v573_v13 = vadd.f32 %v572_v60, %v438_v55 }
  0xf0   : > { %v806_v14 = vpop.f32.mrf.mxu1  ;;  %v666_v19 = vpop.f32.mrf.mxu0 }
  0xf1   : > { %v667_v38 = vadd.f32 %v666_v19, %v549_v46  ;;  %v799_v57 = vadd.f32 %v3240_v8, %v674_v49 }
  0xf2   : > { %v3246_v20 = vpop.f32.mrf.mxu1  ;;  %v3227_v24 = vpop.f32.mrf.mxu0 }
  0xf3   : > { %v688_v15 = vadd.f32 %v3227_v24, %v567_v43  ;;  %v791_v44 = vadd.f32 %v790_v2, %v667_v38  ;;  %v585_v38 = vadd.f32 %v584_v0, %v458_v31 }
  0xf4   : > { %v822_v26 = vpop.f32.mrf.mxu1  ;;  %v680_v30 = vpop.f32.mrf.mxu0 }
  0xf5   : > { %v681_v39 = vadd.f32 %v680_v30, %v561_v21  ;;  %v815_v54 = vadd.f32 %v3243_v9, %v688_v15 }
  0xf6   : > { %v3249_v32 = vpop.f32.mrf.mxu1  ;;  %v3230_v36 = vpop.f32.mrf.mxu0 }
  0xf7   : > { %v702_v63 = vadd.f32 %v3230_v36, %v579_v52  ;;  %v807_v8 = vadd.f32 %v806_v14, %v681_v39 }
  0xf8   : > { %v3947_v42 = vpop.f32.mrf.mxu1  ;;  %v694_v45 = vpop.f32.mrf.mxu0 }
  0xf9   : > { %v695_v46 = vadd.f32 %v694_v45, %v573_v13  ;;  %v831_v21 = vadd.f32 %v3246_v20, %v702_v63 }
  0xfa   : > { %v3272_v50 = vpop.f32.mrf.mxu1  ;;  %v3233_v48 = vpop.f32.mrf.mxu0 }
  0xfb   : > { %v716_v2 = vadd.f32 %v3233_v48, %v591_v1  ;;  %v823_v9 = vadd.f32 %v822_v26, %v695_v46 }
  0xfc   : > { %v1038_v35 = vpop.f32.mrf.mxu1  ;;  %v708_v27 = vpop.f32.mrf.mxu0 }
  0xfd   : > { %v847_v0 = vadd.f32 %v3249_v32, %v716_v2 }
  0xfe   : > { %v3275_v10 = vpop.f32.mrf.mxu1  ;;  %v3256_v25 = vpop.f32.mrf.mxu0 }
  0xff   : > { %v930_v53 = vadd.f32 %v3256_v25, %v799_v57 }
 0x100   : > { %v1050_v61 = vpop.f32.mrf.mxu1  ;;  %v923_v37 = vpop.f32.mrf.mxu0 }
 0x101   : > { %v1045_v19 = vadd.f32 %v3272_v50, %v930_v53  ;;  %v924_v41 = vadd.f32 %v923_v37, %v791_v44  ;;  %v709_v44 = vadd.f32 %v708_v27, %v585_v38 }
 0x102   : > { %v3259_v56 = vpop.f32.mrf.mxu0  ;;  %v3278_v43 = vpop.f32.mrf.mxu1 }
 0x103   : > { %v1085_v58 = vmax.f32 %v1045_v19, 0.0  ;;  %v1039_v4 = vadd.f32 %v1038_v35, %v924_v41  ;;  %v942_v24 = vadd.f32 %v3259_v56, %v815_v54  ;;  %v839_v51 = vadd.f32 %v3947_v42, %v709_v44 }
 0x104   : > { %v935_v30 = vpop.f32.mrf.mxu0  ;;  %v1062_v45 = vpop.f32.mrf.mxu1 }
 0x105   : > { %v1112_v60 = vsel %vm1107_vm1, %v1085_v58, 0  ;;  %v1084_v5 = vmax.f32 %v1039_v4, 0.0  ;;  %v1057_v18 = vadd.f32 %v3275_v10, %v942_v24  ;;  %v936_v15 = vadd.f32 %v935_v30, %v807_v8 }
 0x106   : > { %v3950_v62 = vand.u32 4294901760, %v1112_v60  ;;  %v3262_v36 = vpop.f32.mrf.mxu0  ;;  %v3281_v59 = vpop.f32.mrf.mxu1 }
 0x107   : > { %v1109_v39 = vsel %vm1107_vm1, %v1084_v5, 0  ;;  %v1087_v14 = vmax.f32 %v1057_v18, 0.0  ;;  %v1051_v35 = vadd.f32 %v1050_v61, %v936_v15  ;;  %v954_v47 = vadd.f32 %v3262_v36, %v831_v21 }
 0x108   : > { %v3954_v48 = vsub.f32 %v1112_v60, %v3950_v62  ;;  %v3956_v20 = vand.u32 4294901760, %v1109_v39  ;;  %v947_v49 = vpop.f32.mrf.mxu0  ;;  %v1074_v8 = vpop.f32.mrf.mxu1 }
 0x109   : > { %v1118_v10 = vsel %vm1107_vm1, %v1087_v14, 0  ;;  %v1086_v26 = vmax.f32 %v1051_v35, 0.0  ;;  %v1069_v27 = vadd.f32 %v3278_v43, %v954_v47  ;;  %v948_v50 = vadd.f32 %v947_v49, %v823_v9 }
 0x10a   : > { %v1217_v55 = vand.u32 4294901760, %v3954_v48  ;;  %v3962_v57 = vsub.f32 %v1109_v39, %v3956_v20  ;;  %v3964_v52 = vand.u32 4294901760, %v1118_v10  ;;  %v3265_v32 = vpop.f32.mrf.mxu0  ;;  %3326 = vmatprep.mubr.f32.mxu1 %v3956_v20 }
 0x10b   : > { %v1115_v25 = vsel %vm1107_vm1, %v1086_v26, 0  ;;  %v1089_v53 = vmax.f32 %v1069_v27, 0.0  ;;  %v1063_v61 = vadd.f32 %v1062_v45, %v948_v50  ;;  %v966_v13 = vadd.f32 %v3265_v32, %v847_v0  ;;  %3327 = vmatmul.mubr.f32.vlgmr.msra.gmra.mxu1 %v3950_v62 }
 0x10c   : > { %v1218_v42 = vsub.f32 %v3954_v48, %v1217_v55  ;;  %v3973_v31 = vsub.f32 %v1118_v10, %v3964_v52  ;;  %v3975_v63 = vand.u32 4294901760, %v1115_v25  ;;  %v959_v37 = vpop.f32.mrf.mxu0  ;;  %3367 = vmatpush3.msra.mxu1 %v3825_v3  ;;  %v1207_v54 = vand.u32 4294901760, %v3962_v57 }
 0x10d   : > { %v1124_v19 = vsel %vm1107_vm1, %v1089_v53, 0  ;;  %v1088_v41 = vmax.f32 %v1063_v61, 0.0  ;;  %v1081_v1 = vadd.f32 %v3281_v59, %v966_v13  ;;  %v960_v46 = vadd.f32 %v959_v37, %v839_v51  ;;  %3368 = vmatprep.subr.mxu1 %v3833_v7  ;;  %v4522_v61 = vld [vmem:[#allocation8_spill] sm:$0xff] }
 0x10e   : > { %v3982_v56 = vsub.f32 %v1115_v25, %v3975_v63  ;;  %v3984_v43 = vand.u32 4294901760, %v1124_v19  ;;  %3329 = vmatprep.mubr.f32.mxu1 %v3975_v63  ;;  %3369 = vmatpush3.msra.mxu1 %v3833_v7  ;;  %v1208_v58 = vsub.f32 %v3962_v57, %v1207_v54  ;;  %v1237_v21 = vand.u32 4294901760, %v3973_v31 }
 0x10f   : > { %v1121_v4 = vsel %vm1107_vm1, %v1088_v41, 0  ;;  %v1091_v24 = vmax.f32 %v1081_v1, 0.0  ;;  %v1075_v38 = vadd.f32 %v1074_v8, %v960_v46  ;;  %3330 = vmatmul.mubr.f32.gmra.mxu1 %v3964_v52  ;;  %3370 = vmatprep.subr.mxu1 %v3846_v12  ;;  %v1219_v5 = vand.u32 4294901760, %v1218_v42  ;;  %v1981_v41 = vld [vmem:[%s4467_s5 + $0x18] sm:$0xff] }
 0x110   : > { %v3995_v2 = vand.u32 4294901760, %v1121_v4  ;;  %3371 = vmatpush3.msra.mxu1 %v3846_v12  ;;  %v1209_v30 = vand.u32 4294901760, %v1208_v58  ;;  %v1227_v60 = vand.u32 4294901760, %v3982_v56  ;;  %v4000_v18 = vsub.f32 %v1124_v19, %v3984_v43  ;;  %v1980_v58 = vld [vmem:[%s4467_s5 + $0x10] sm:$0xff] }
 0x111   : > { %v1130_v15 = vsel %vm1107_vm1, %v1091_v24, 0  ;;  %v1090_v9 = vmax.f32 %v1075_v38, 0.0  ;;  %3372 = vmatprep.subr.mxu1 %v3861_v17  ;;  %v1238_v14 = vsub.f32 %v3973_v31, %v1237_v21  ;;  %v4175_v8 = vand.u32 4294901760, %v1981_v41 }
 0x112   : > { %v4005_v44 = vsub.f32 %v1121_v4, %v3995_v2  ;;  %3298 = vmatprep.mubr.f32.mxu0 %v1209_v30  ;;  %3332 = vmatprep.mubr.f32.mxu1 %v3995_v2  ;;  %v1228_v36 = vsub.f32 %v3982_v56, %v1227_v60  ;;  %v4009_v45 = vand.u32 4294901760, %v1130_v15  ;;  %v1257_v49 = vand.u32 4294901760, %v4000_v18  ;;  %v1979_v30 = vld [vmem:[%s4467_s5 + $0x8] sm:$0xff] }
 0x113   : > { %v1127_v39 = vsel %vm1107_vm1, %v1090_v9, 0  ;;  %3373 = vmatpush3.msra.mxu1 %v3861_v17  ;;  %3299 = vmatmul.mubr.f32.vlgmr.msra.gmra.mxu0 %v1219_v5  ;;  %v1239_v27 = vand.u32 4294901760, %v1238_v14 }
 0x114   : > { %v4016_v35 = vand.u32 4294901760, %v1127_v39  ;;  %3333 = vmatmul.mubr.f32.gmra.mxu1 %v3984_v43  ;;  %3339 = vmatpush3.msra.mxu0 %v3831_v6  ;;  %v1229_v47 = vand.u32 4294901760, %v1228_v36  ;;  %v1247_v0 = vand.u32 4294901760, %v4005_v44  ;;  %v4031_v6 = vsub.f32 %v1130_v15, %v4009_v45 }
 0x115   : > { %3374 = vmatprep.subr.mxu1 %v3877_v23  ;;  %3340 = vmatprep.subr.mxu0 %v3844_v11  ;;  %v4200_v15 = vand.u32 4294901760, %v1979_v30 }
 0x116   : > { %v4025_v10 = vsub.f32 %v1127_v39, %v4016_v35  ;;  %3375 = vmatpush3.msra.mxu1 %v3877_v23  ;;  %3341 = vmatpush3.msra.mxu0 %v3844_v11  ;;  %v1248_v26 = vsub.f32 %v4005_v44, %v1247_v0  ;;  %v1258_v11 = vsub.f32 %v4000_v18, %v1257_v49  ;;  %v1277_v32 = vand.u32 4294901760, %v4031_v6 }
 0x117   : > { %3376 = vmatprep.subr.mxu1 %v3888_v28  ;;  %3301 = vmatprep.mubr.f32.mxu0 %v1229_v47  ;;  %v4214_v39 = vsub.f32 %v1979_v30, %v4200_v15 }
 0x118   : > { %3335 = vmatprep.mubr.f32.mxu1 %v4016_v35  ;;  %3342 = vmatprep.subr.mxu0 %v3859_v16  ;;  %v1267_v50 = vand.u32 4294901760, %v4025_v10  ;;  %v1249_v51 = vand.u32 4294901760, %v1248_v26  ;;  %v1259_v25 = vand.u32 4294901760, %v1258_v11 }
 0x119   : > { %3377 = vmatpush3.msra.mxu1 %v3888_v28  ;;  %3302 = vmatmul.mubr.f32.gmra.mxu0 %v1239_v27 }
 0x11a   : > { %3336 = vmatmul.mubr.f32.gmra.mxu1 %v4009_v45  ;;  %3343 = vmatpush3.msra.mxu0 %v3859_v16  ;;  %v1268_v59 = vsub.f32 %v4025_v10, %v1267_v50  ;;  %v1278_v16 = vsub.f32 %v4031_v6, %v1277_v32 }
 0x11b   : > { %3378 = vmatprep.subr.mxu1 %v3902_v34  ;;  %3344 = vmatprep.subr.mxu0 %v3874_v22 }
 0x11c   : > { %3379 = vmatpush3.msra.mxu1 %v3902_v34  ;;  %3382 = vmatprep.mubr.f32.mxu1 %v1207_v54  ;;  %v1269_v53 = vand.u32 4294901760, %v1268_v59 }
 0x11d   : > { %3345 = vmatpush3.msra.mxu0 %v3874_v22  ;;  %3380 = vmatprep.subr.mxu1 %v3918_v40  ;;  %v1279_v22 = vand.u32 4294901760, %v1278_v16 }
 0x11e   : > { %3304 = vmatprep.mubr.f32.mxu0 %v1249_v51  ;;  %3346 = vmatprep.subr.mxu0 %v3891_v29 }
 0x11f   : > { %3381 = vmatpush3.msra.mxu1 %v3918_v40  ;;  %3305 = vmatmul.mubr.f32.gmra.mxu0 %v1259_v25 }
 0x120   : > { %3347 = vmatpush3.msra.mxu0 %v3891_v29  ;;  %3383 = vmatmul.mubr.f32.vlgmr.msra.gmra.mxu1 %v1217_v55  ;;  %v4523_v29 = vld [vmem:[#allocation10_spill] sm:$0xff] }
 0x121   : > { %3422 = vmatprep.subr.mxu1 %v3825_v3  ;;  %3348 = vmatprep.subr.mxu0 %v3900_v33 }
 0x122   : > { %3385 = vmatprep.mubr.f32.mxu1 %v1227_v60  ;;  %3423 = vmatpush3.msra.mxu1 %v3825_v3  ;;  %v4524_v3 = vld [vmem:[#allocation2_spill] sm:$0xff] }
 0x123   : > { %3349 = vmatpush3.msra.mxu0 %v3900_v33  ;;  %3424 = vmatprep.subr.mxu1 %v3833_v7  ;;  %v4530_v33 = vld [vmem:[#allocation9_spill] sm:$0xff] }
 0x124   : > { %3307 = vmatprep.mubr.f32.mxu0 %v1269_v53  ;;  %3350 = vmatprep.subr.mxu0 %v4522_v61 }
 0x125   : > { %3425 = vmatpush3.msra.mxu1 %v3833_v7  ;;  %3308 = vmatmul.mubr.f32.gmra.mxu0 %v1279_v22  ;;  %v4525_v7 = vld [vmem:[#allocation3_spill] sm:$0xff] }
 0x126   : > { %3351 = vmatpush3.msra.mxu0 %v4522_v61  ;;  %3386 = vmatmul.mubr.f32.gmra.mxu1 %v1237_v21  ;;  %v4186_v21 = vand.u32 4294901760, %v1980_v58 }
 0x127   : > { %3426 = vmatprep.subr.mxu1 %v3846_v12  ;;  %3352 = vmatprep.subr.mxu0 %v4523_v29 }
 0x128   : > { %3354 = vmatprep.mubr.f32.mxu0 %v3962_v57  ;;  %3388 = vmatprep.mubr.f32.mxu1 %v1247_v0  ;;  %v1983_v57 = vld [vmem:[%s4467_s5 + $0x28] sm:$0xff]  ;;  %v4225_v0 = vand.u32 4294901760, %v4214_v39 }
 0x129   : > { %3427 = vmatpush3.msra.mxu1 %v3846_v12  ;;  %3353 = vmatpush3.msra.mxu0 %v4523_v29  ;;  %v4526_v12 = vld [vmem:[#allocation4_spill] sm:$0xff]  ;;  %v4144_v42 = vand.u32 4294901760, %v1983_v57 }
 0x12a   : > { %3428 = vmatprep.subr.mxu1 %v3861_v17  ;;  %3394 = vmatprep.subr.mxu0 %v4524_v3  ;;  %4540 = vst [vmem:[#allocation9_spill] sm:$0xff] %v4225_v0 }
 0x12b   : > { %3429 = vmatpush3.msra.mxu1 %v3861_v17  ;;  %3355 = vmatmul.mubr.f32.vlgmr.msra.gmra.mxu0 %v3954_v48  ;;  %v4527_v17 = vld [vmem:[#allocation5_spill] sm:$0xff]  ;;  %v1984_v48 = vld [vmem:[%s4467_s5 + $0x30] sm:$0xff]  ;;  %v4157_v54 = vsub.f32 %v1983_v57, %v4144_v42 }
 0x12c   : > { %3389 = vmatmul.mubr.f32.gmra.mxu1 %v1257_v49  ;;  %3395 = vmatpush3.msra.mxu0 %v4524_v3  ;;  %v4131_v55 = vand.u32 4294901760, %v1984_v48 }
 0x12d   : > { %3430 = vmatprep.subr.mxu1 %v3877_v23  ;;  %3357 = vmatprep.mubr.f32.mxu0 %v3982_v56  ;;  %v4169_v56 = vand.u32 4294901760, %v4157_v54 }
 0x12e   : > { %3391 = vmatprep.mubr.f32.mxu1 %v1267_v50  ;;  %3396 = vmatprep.subr.mxu0 %v4525_v7  ;;  %v4142_v13 = vsub.f32 %v1984_v48, %v4131_v55 }
 0x12f   : > { %3431 = vmatpush3.msra.mxu1 %v3877_v23  ;;  %3397 = vmatpush3.msra.mxu0 %v4525_v7  ;;  %v4528_v23 = vld [vmem:[#allocation6_spill] sm:$0xff]  ;;  %4534 = vst [vmem:[#allocation2_spill] sm:$0xff] %v4169_v56  ;;  %v2204_v24 = vsub.f32 %v4157_v54, %v4169_v56 }
 0x130   : > { %3432 = vmatprep.subr.mxu1 %v3888_v28  ;;  %3398 = vmatprep.subr.mxu0 %v4526_v12  ;;  %v4154_v37 = vand.u32 4294901760, %v4142_v13 }
 0x131   : > { %3433 = vmatpush3.msra.mxu1 %v3888_v28  ;;  %3358 = vmatmul.mubr.f32.gmra.mxu0 %v3973_v31  ;;  %v4529_v28 = vld [vmem:[#allocation7_spill] sm:$0xff]  ;;  %v1982_v31 = vld [vmem:[%s4467_s5 + $0x20] sm:$0xff]  ;;  %v2205_v60 = vand.u32 4294901760, %v2204_v24 }
 0x132   : > { %3392 = vmatmul.mubr.f32.gmra.mxu1 %v1277_v32  ;;  %3399 = vmatpush3.msra.mxu0 %v4526_v12  ;;  %4533 = vst [vmem:[#allocation10_spill] sm:$0xff] %v4154_v37  ;;  %v4159_v19 = vand.u32 4294901760, %v1982_v31  ;;  %v2197_v46 = vsub.f32 %v4142_v13, %v4154_v37  ;;  %4539 = vst [vmem:[#allocation7_spill] sm:$0xff] %v4214_v39 }
 0x133   : > { %3434 = vmatprep.subr.mxu1 %v3902_v34  ;;  %3360 = vmatprep.mubr.f32.mxu0 %v4005_v44  ;;  %v1978_v44 = vld [vmem:[%s4467_s5] sm:$0xff] }
 0x134   : > { %3400 = vmatprep.subr.mxu0 %v4527_v17  ;;  %3435 = vmatpush3.msra.mxu1 %v3902_v34  ;;  %v4531_v34 = vld [vmem:[#allocation11_spill] sm:$0xff]  ;;  %v2198_v4 = vand.u32 4294901760, %v2197_v46  ;;  %v4216_v14 = vand.u32 4294901760, %v1978_v44 }
 0x135   : > { %3438 = vmatprep.mubr.f32.mxu1 %v3956_v20  ;;  %3401 = vmatpush3.msra.mxu0 %v4527_v17 }
 0x136   : > { %3436 = vmatprep.subr.mxu1 %v3918_v40  ;;  %3402 = vmatprep.subr.mxu0 %v4528_v23  ;;  %v4228_v49 = vsub.f32 %v1978_v44, %v4216_v14 }
 0x137   : > { %3437 = vmatpush3.msra.mxu1 %v3918_v40  ;;  %3361 = vmatmul.mubr.f32.gmra.mxu0 %v4000_v18  ;;  %v1985_v40 = vld [vmem:[%s4467_s5 + $0x38] sm:$0xff]  ;;  %v4198_v18 = vsub.f32 %v1980_v58, %v4186_v21  ;;  %v2930_v58 = vld [vmem:[%s4466_s4] ss:$0 sm:$0xff] }
 0x138   : > { %3403 = vmatpush3.msra.mxu0 %v4528_v23  ;;  %3439 = vmatmul.mubr.f32.vlgmr.msra.gmra.mxu1 %v3950_v62  ;;  %4541 = vst [vmem:[#allocation11_spill] sm:$0xff] %v4228_v49  ;;  %v4235_v27 = vand.u32 4294901760, %v4228_v49 }
 0x139   : > { %3363 = vmatprep.mubr.f32.mxu0 %v4025_v10  ;;  %3404 = vmatprep.subr.mxu0 %v4529_v28  ;;  %4536 = vst [vmem:[#allocation4_spill] sm:$0xff] %v4198_v18 }
 0x13a   : > { %3441 = vmatprep.mubr.f32.mxu1 %v3975_v63  ;;  %3405 = vmatpush3.msra.mxu0 %v4529_v28  ;;  %4542 = vst [vmem:[#allocation12_spill] sm:$0xff] %v4235_v27  ;;  %v2239_v11 = vsub.f32 %v4228_v49, %v4235_v27 }
 0x13b   : > { %3406 = vmatprep.subr.mxu0 %v4530_v33  ;;  %3364 = vmatmul.mubr.f32.gmra.mxu0 %v4031_v6  ;;  %v2232_v6 = vsub.f32 %v4214_v39, %v4225_v0 }
 0x13c   : > { %3407 = vmatpush3.msra.mxu0 %v4530_v33  ;;  %3442 = vmatmul.mubr.f32.gmra.mxu1 %v3964_v52  ;;  %v2240_v51 = vand.u32 4294901760, %v2239_v11 }
 0x13d   : > { %3408 = vmatprep.subr.mxu0 %v4531_v34  ;;  %3410 = vmatprep.mubr.f32.mxu0 %v3956_v20  ;;  %v2233_v50 = vand.u32 4294901760, %v2232_v6 }
 0x13e   : > { %3444 = vmatprep.mubr.f32.mxu1 %v3995_v2  ;;  %3409 = vmatpush3.msra.mxu0 %v4531_v34 }
 0x13f   : > { %3411 = vmatmul.mubr.f32.vlgmr.msra.gmra.mxu0 %v3950_v62  ;;  %v4123_v62 = vand.u32 4294901760, %v1985_v40 }
 0x140   : > { %3445 = vmatmul.mubr.f32.gmra.mxu1 %v3984_v43  ;;  %3413 = vmatprep.mubr.f32.mxu0 %v3975_v63 }
 0x141   : > { %3447 = vmatprep.mubr.f32.mxu1 %v4016_v35  ;;  %v4129_v20 = vsub.f32 %v1985_v40, %v4123_v62  ;;  %3450 = vmatprep.subr.mxu0 %v4123_v62 }
 0x142   : > { %3451 = vmatpush3.msra.mxu0 %v4123_v62 }
 0x143   : > { %3414 = vmatmul.mubr.f32.gmra.mxu0 %v3964_v52  ;;  %v4139_v52 = vand.u32 4294901760, %v4129_v20  ;;  %3452 = vmatprep.subr.mxu0 %v4131_v55 }
 0x144   : > { %3448 = vmatmul.mubr.f32.gmra.mxu1 %v4009_v45  ;;  %3416 = vmatprep.mubr.f32.mxu0 %v3995_v2  ;;  %v4189_v2 = vsub.f32 %v1981_v41, %v4175_v8 }
 0x145   : > { %4532 = vst [vmem:[#allocation8_spill] sm:$0xff] %v4139_v52  ;;  %3453 = vmatpush3.msra.mxu0 %v4131_v55  ;;  %v2190_v63 = vsub.f32 %v4129_v20, %v4139_v52 }
 0x146   : > { %3454 = vmatprep.subr.mxu0 %v4144_v42  ;;  %v4204_v9 = vand.u32 4294901760, %v4189_v2 }
 0x147   : > { %3417 = vmatmul.mubr.f32.gmra.mxu0 %v3984_v43  ;;  %v2191_v1 = vand.u32 4294901760, %v2190_v63  ;;  %v4172_v43 = vsub.f32 %v1982_v31, %v4159_v19 }
 0x148   : > { %3419 = vmatprep.mubr.f32.mxu0 %v4016_v35  ;;  %3455 = vmatpush3.msra.mxu0 %v4144_v42  ;;  %4537 = vst [vmem:[#allocation5_spill] sm:$0xff] %v4204_v9  ;;  %v2218_v35 = vsub.f32 %v4189_v2, %v4204_v9 }
 0x149   : > { %3456 = vmatprep.subr.mxu0 %v4159_v19  ;;  %3478 = vmatprep.subr.mxu1 %v2191_v1  ;;  %v4184_v38 = vand.u32 4294901760, %v4172_v43 }
 0x14a   : > { %3457 = vmatpush3.msra.mxu0 %v4159_v19  ;;  %3479 = vmatpush3.msra.mxu1 %v2191_v1  ;;  %v2219_v10 = vand.u32 4294901760, %v2218_v35 }
 0x14b   : > { %3420 = vmatmul.mubr.f32.gmra.mxu0 %v4009_v45  ;;  %4535 = vst [vmem:[#allocation3_spill] sm:$0xff] %v4184_v38  ;;  %3458 = vmatprep.subr.mxu0 %v4175_v8  ;;  %v2211_v5 = vsub.f32 %v4172_v43, %v4184_v38  ;;  %v4211_v45 = vand.u32 4294901760, %v4198_v18 }
 0x14c   : > { %3480 = vmatprep.subr.mxu1 %v2198_v4  ;;  %3459 = vmatpush3.msra.mxu0 %v4175_v8 }
 0x14d   : > { %3481 = vmatpush3.msra.mxu1 %v2198_v4  ;;  %3460 = vmatprep.subr.mxu0 %v4186_v21  ;;  %v2212_v36 = vand.u32 4294901760, %v2211_v5  ;;  %4538 = vst [vmem:[#allocation6_spill] sm:$0xff] %v4211_v45  ;;  %v2225_v47 = vsub.f32 %v4198_v18, %v4211_v45 }
 0x14e   : > { %3482 = vmatprep.subr.mxu1 %v2205_v60  ;;  %3461 = vmatpush3.msra.mxu0 %v4186_v21 }
 0x14f   : > { %3483 = vmatpush3.msra.mxu1 %v2205_v60  ;;  %3462 = vmatprep.subr.mxu0 %v4200_v15  ;;  %v2226_v26 = vand.u32 4294901760, %v2225_v47 }
 0x150   : > { %3484 = vmatprep.subr.mxu1 %v2212_v36  ;;  %3463 = vmatpush3.msra.mxu0 %v4200_v15 }
 0x151   : > { %3485 = vmatpush3.msra.mxu1 %v2212_v36  ;;  %3464 = vmatprep.subr.mxu0 %v4216_v14 }
 0x152   : > { %3465 = vmatpush3.msra.mxu0 %v4216_v14  ;;  %3486 = vmatprep.subr.mxu1 %v2219_v10 }
 0x153   : > { %3506 = vmatprep.subr.mxu0 %v4129_v20  ;;  %3487 = vmatpush3.msra.mxu1 %v2219_v10 }
 0x154   : > { %3488 = vmatprep.subr.mxu1 %v2226_v26 }
 0x155   : > { %3489 = vmatpush3.msra.mxu1 %v2226_v26 }
 0x156   : > { %3490 = vmatprep.subr.mxu1 %v2233_v50 }
 0x157   : > { %3491 = vmatpush3.msra.mxu1 %v2233_v50 }
 0x158   : > { %3492 = vmatprep.subr.mxu1 %v2240_v51 }
 0x159   : > { %3493 = vmatpush3.msra.mxu1 %v2240_v51 }
 0x15a   : > { %3534 = vmatprep.subr.mxu1 %v4123_v62 }
 0x1cb   : > { %v3328_v32 = vpop.f32.mrf.mxu1 }
 0x1cd   : > { %v1392_v59 = vpop.f32.mrf.mxu1 }
 0x1cf   : > { %v3331_v25 = vpop.f32.mrf.mxu1 }
 0x1d1   : > { %v1404_v16 = vpop.f32.mrf.mxu1 }
 0x1d3   : > { %v3300_v53 = vpop.f32.mrf.mxu0 }
 0x1d4   : > { %v3334_v22 = vpop.f32.mrf.mxu1  ;;  %v1222_v60 = vadd.f32 %v3300_v53, %v2930_v58 }
 0x1d5   : > { %v1211_v61 = vpop.f32.mrf.mxu0 }
 0x1d6   : > { %v1416_v29 = vpop.f32.mrf.mxu1  ;;  %v1212_v44 = vadd.f32 %v2930_v58, %v1211_v61  ;;  %v1399_v47 = vadd.f32 %v3328_v32, %v1222_v60 }
 0x1d8   : > { %v1393_v11 = vadd.f32 %v1392_v59, %v1212_v44 }
 0x1d9   : > { %v3303_v3 = vpop.f32.mrf.mxu0 }
 0x1da   : > { %v3337_v7 = vpop.f32.mrf.mxu1  ;;  %v1242_v35 = vadd.f32 %v3303_v3, %v2930_v58 }
 0x1db   : > { %v1231_v12 = vpop.f32.mrf.mxu0 }
 0x1dc   : > { %v1428_v17 = vpop.f32.mrf.mxu1  ;;  %v1232_v6 = vadd.f32 %v2930_v58, %v1231_v12  ;;  %v1411_v9 = vadd.f32 %v3331_v25, %v1242_v35 }
 0x1de   : > { %v1405_v52 = vadd.f32 %v1404_v16, %v1232_v6 }
 0x1df   : > { %v3306_v23 = vpop.f32.mrf.mxu0 }
 0x1e0   : > { %v3384_v28 = vpop.f32.mrf.mxu1  ;;  %v1262_v27 = vadd.f32 %v3306_v23, %v2930_v58 }
 0x1e1   : > { %v1251_v33 = vpop.f32.mrf.mxu0 }
 0x1e2   : > { %v1652_v34 = vpop.f32.mrf.mxu1  ;;  %v1252_v56 = vadd.f32 %v2930_v58, %v1251_v33  ;;  %v1423_v39 = vadd.f32 %v3334_v22, %v1262_v27 }
 0x1e4   : > { %v1417_v44 = vadd.f32 %v1416_v29, %v1252_v56 }
 0x1e5   : > { %v3309_v40 = vpop.f32.mrf.mxu0 }
 0x1e6   : > { %v3387_v48 = vpop.f32.mrf.mxu1  ;;  %v1282_v61 = vadd.f32 %v3309_v40, %v2930_v58 }
 0x1e7   : > { %v1271_v57 = vpop.f32.mrf.mxu0 }
 0x1e8   : > { %v1668_v31 = vpop.f32.mrf.mxu1  ;;  %v1435_v33 = vadd.f32 %v3337_v7, %v1282_v61 }
 0x1eb   : > { %v3356_v63 = vpop.f32.mrf.mxu0 }
 0x1ec   : > { %v3390_v41 = vpop.f32.mrf.mxu1  ;;  %v1530_v50 = vadd.f32 %v3356_v63, %v1399_v47  ;;  %v1272_v63 = vadd.f32 %v2930_v58, %v1271_v57 }
 0x1ed   : > { %v1522_v1 = vpop.f32.mrf.mxu0 }
 0x1ee   : > { %v1684_v46 = vpop.f32.mrf.mxu1  ;;  %v1523_v45 = vadd.f32 %v1522_v1, %v1393_v11  ;;  %v1661_v49 = vadd.f32 %v3384_v28, %v1530_v50 }
 0x1f0   : > { %v1653_v12 = vadd.f32 %v1652_v34, %v1523_v45 }
 0x1f1   : > { %v3359_v4 = vpop.f32.mrf.mxu0 }
 0x1f2   : > { %v4245_v24 = vpop.f32.mrf.mxu1  ;;  %v1544_v53 = vadd.f32 %v3359_v4, %v1411_v9  ;;  %v1429_v4 = vadd.f32 %v1428_v17, %v1272_v63 }
 0x1f3   : > { %v1536_v30 = vpop.f32.mrf.mxu0 }
 0x1f4   : > { %v4247_v5 = vpop.f32.mrf.mxu1  ;;  %v1537_v60 = vadd.f32 %v1536_v30, %v1405_v52  ;;  %v1677_v25 = vadd.f32 %v3387_v48, %v1544_v53 }
 0x1f6   : > { %v1669_v27 = vadd.f32 %v1668_v31, %v1537_v60 }
 0x1f7   : > { %v3362_v36 = vpop.f32.mrf.mxu0 }
 0x1f8   : > { %v3440_v10 = vpop.f32.mrf.mxu1  ;;  %v1558_v59 = vadd.f32 %v3362_v36, %v1423_v39 }
 0x1f9   : > { %v1550_v26 = vpop.f32.mrf.mxu0 }
 0x1fa   : > { %v1924_v51 = vpop.f32.mrf.mxu1  ;;  %v1551_v35 = vadd.f32 %v1550_v26, %v1417_v44 }
 0x1fb   : > { %v3365_v0 = vpop.f32.mrf.mxu0 }
 0x1fc   : > { %v3443_v38 = vpop.f32.mrf.mxu1  ;;  %v1572_v22 = vadd.f32 %v3365_v0, %v1435_v33  ;;  %v1685_v57 = vadd.f32 %v1684_v46, %v1551_v35 }
 0x1fd   : > { %v1564_v37 = vpop.f32.mrf.mxu0 }
 0x1fe   : > { %v1936_v3 = vpop.f32.mrf.mxu1 }
 0x1ff   : > { %v3412_v32 = vpop.f32.mrf.mxu0 }
 0x200   : > { %v1810_v18 = vadd.f32 %v3412_v32, %v1661_v49  ;;  %v3446_v11 = vpop.f32.mrf.mxu1  ;;  %v1693_v49 = vadd.f32 %v3390_v41, %v1558_v59 }
 0x201   : > { %v1803_v23 = vpop.f32.mrf.mxu0 }
 0x202   : > { %v1931_v47 = vadd.f32 %v3440_v10, %v1810_v18  ;;  %v1804_v1 = vadd.f32 %v1803_v23, %v1653_v12  ;;  %v1565_v18 = vadd.f32 %v1564_v37, %v1429_v4  ;;  %v1948_v48 = vpop.f32.mrf.mxu1 }
 0x203   : > { %v3415_v9 = vpop.f32.mrf.mxu0 }
 0x204   : > { %v1971_v16 = vmax.f32 %v1931_v47, 0.0  ;;  %v1925_v28 = vadd.f32 %v1924_v51, %v1804_v1  ;;  %v1822_v40 = vadd.f32 %v3415_v9, %v1677_v25  ;;  %v3449_v53 = vpop.f32.mrf.mxu1 }
 0x205   : > { %v1815_v52 = vpop.f32.mrf.mxu0 }
 0x206   : > { %v1997_v45 = vsel %vm1107_vm1, %v1971_v16, 0  ;;  %v1970_v39 = vmax.f32 %v1925_v28, 0.0  ;;  %v1943_v56 = vadd.f32 %v3443_v38, %v1822_v40  ;;  %v1816_v29 = vadd.f32 %v1815_v52, %v1669_v27 }
 0x207   : > { %v4250_v34 = vand.u32 4294901760, %v1997_v45  ;;  %v3418_v7 = vpop.f32.mrf.mxu0  ;;  %v1709_v38 = vadd.f32 %v4245_v24, %v1572_v22 }
 0x208   : > { %v1994_v58 = vsel %vm1107_vm1, %v1970_v39, 0  ;;  %v1973_v30 = vmax.f32 %v1943_v56, 0.0  ;;  %v1937_v36 = vadd.f32 %v1936_v3, %v1816_v29  ;;  %v1834_v31 = vadd.f32 %v3418_v7, %v1693_v49 }
 0x209   : > { %v4254_v0 = vsub.f32 %v1997_v45, %v4250_v34  ;;  %v4256_v17 = vand.u32 4294901760, %v1994_v58  ;;  %v1827_v41 = vpop.f32.mrf.mxu0  ;;  %v1701_v3 = vadd.f32 %v4247_v5, %v1565_v18 }
 0x20a   : > { %v2003_v37 = vsel %vm1107_vm1, %v1973_v30, 0  ;;  %v1972_v10 = vmax.f32 %v1937_v36, 0.0  ;;  %v1955_v26 = vadd.f32 %v3446_v11, %v1834_v31  ;;  %v1828_v6 = vadd.f32 %v1827_v41, %v1685_v57  ;;  %v1960_v11 = vpop.f32.mrf.mxu1 }
 0x20b   : > { %v2102_v46 = vand.u32 4294901760, %v4254_v0  ;;  %v4262_v50 = vsub.f32 %v1994_v58, %v4256_v17  ;;  %v4264_v51 = vand.u32 4294901760, %v2003_v37  ;;  %v3421_v61 = vpop.f32.mrf.mxu0  ;;  %3494 = vmatprep.mubr.f32.mxu1 %v4256_v17 }
 0x20c   : > { %v2000_v24 = vsel %vm1107_vm1, %v1972_v10, 0  ;;  %v1975_v32 = vmax.f32 %v1955_v26, 0.0  ;;  %v1949_v60 = vadd.f32 %v1948_v48, %v1828_v6  ;;  %v1846_v12 = vadd.f32 %v3421_v61, %v1709_v38  ;;  %3495 = vmatmul.mubr.f32.vlgmr.msra.gmra.mxu1 %v4250_v34 }
 0x20d   : > { %v2103_v63 = vsub.f32 %v4254_v0, %v2102_v46  ;;  %v4274_v59 = vsub.f32 %v2003_v37, %v4264_v51  ;;  %v4276_v44 = vand.u32 4294901760, %v2000_v24  ;;  %v1839_v23 = vpop.f32.mrf.mxu0  ;;  %3535 = vmatpush3.msra.mxu1 %v4123_v62  ;;  %v2092_v5 = vand.u32 4294901760, %v4262_v50 }
 0x20e   : > { %v2009_v47 = vsel %vm1107_vm1, %v1975_v32, 0  ;;  %v1974_v1 = vmax.f32 %v1949_v60, 0.0  ;;  %v1967_v25 = vadd.f32 %v3449_v53, %v1846_v12  ;;  %v1840_v35 = vadd.f32 %v1839_v23, %v1701_v3  ;;  %3536 = vmatprep.subr.mxu1 %v4131_v55  ;;  %v4544_v60 = vld [vmem:[#allocation7_spill] sm:$0xff] }
 0x20f   : > { %v4283_v33 = vsub.f32 %v2000_v24, %v4276_v44  ;;  %v4285_v9 = vand.u32 4294901760, %v2009_v47  ;;  %3497 = vmatprep.mubr.f32.mxu1 %v4276_v44  ;;  %3537 = vmatpush3.msra.mxu1 %v4131_v55  ;;  %v2093_v16 = vsub.f32 %v4262_v50, %v2092_v5  ;;  %v2122_v22 = vand.u32 4294901760, %v4274_v59 }
 0x210   : > { %v2006_v28 = vsel %vm1107_vm1, %v1974_v1, 0  ;;  %v1977_v40 = vmax.f32 %v1967_v25, 0.0  ;;  %v1961_v27 = vadd.f32 %v1960_v11, %v1840_v35  ;;  %3498 = vmatmul.mubr.f32.gmra.mxu1 %v4264_v51  ;;  %3538 = vmatprep.subr.mxu1 %v4144_v42  ;;  %v2104_v45 = vand.u32 4294901760, %v2103_v63 }
 0x211   : > { %v4296_v4 = vand.u32 4294901760, %v2006_v28  ;;  %3539 = vmatpush3.msra.mxu1 %v4144_v42  ;;  %v2094_v52 = vand.u32 4294901760, %v2093_v16  ;;  %v2112_v49 = vand.u32 4294901760, %v4283_v33  ;;  %v4301_v39 = vsub.f32 %v2009_v47, %v4285_v9 }
 0x212   : > { %v2015_v56 = vsel %vm1107_vm1, %v1977_v40, 0  ;;  %v1976_v29 = vmax.f32 %v1961_v27, 0.0  ;;  %3540 = vmatprep.subr.mxu1 %v4159_v19  ;;  %v2123_v58 = vsub.f32 %v4274_v59, %v2122_v22 }
 0x213   : > { %v4306_v18 = vsub.f32 %v2006_v28, %v4296_v4  ;;  %3466 = vmatprep.mubr.f32.mxu0 %v2094_v52  ;;  %3500 = vmatprep.mubr.f32.mxu1 %v4296_v4  ;;  %v2113_v48 = vsub.f32 %v4283_v33, %v2112_v49  ;;  %v4310_v7 = vand.u32 4294901760, %v2015_v56  ;;  %v2142_v41 = vand.u32 4294901760, %v4301_v39 }
 0x214   : > { %v2012_v57 = vsel %vm1107_vm1, %v1976_v29, 0  ;;  %3541 = vmatpush3.msra.mxu1 %v4159_v19  ;;  %3467 = vmatmul.mubr.f32.vlgmr.msra.gmra.mxu0 %v2104_v45  ;;  %v2124_v10 = vand.u32 4294901760, %v2123_v58 }
 0x215   : > { %v4317_v30 = vand.u32 4294901760, %v2012_v57  ;;  %3501 = vmatmul.mubr.f32.gmra.mxu1 %v4285_v9  ;;  %3507 = vmatpush3.msra.mxu0 %v4129_v20  ;;  %v2114_v36 = vand.u32 4294901760, %v2113_v48  ;;  %v2132_v31 = vand.u32 4294901760, %v4306_v18  ;;  %v4332_v20 = vsub.f32 %v2015_v56, %v4310_v7 }
 0x216   : > { %3542 = vmatprep.subr.mxu1 %v4175_v8  ;;  %3508 = vmatprep.subr.mxu0 %v4142_v13 }
 0x217   : > { %v4326_v38 = vsub.f32 %v2012_v57, %v4317_v30  ;;  %3543 = vmatpush3.msra.mxu1 %v4175_v8  ;;  %3509 = vmatpush3.msra.mxu0 %v4142_v13  ;;  %v2133_v37 = vsub.f32 %v4306_v18, %v2132_v31  ;;  %v2143_v13 = vsub.f32 %v4301_v39, %v2142_v41  ;;  %v2162_v53 = vand.u32 4294901760, %v4332_v20 }
 0x218   : > { %3544 = vmatprep.subr.mxu1 %v4186_v21  ;;  %3469 = vmatprep.mubr.f32.mxu0 %v2114_v36 }
 0x219   : > { %3503 = vmatprep.mubr.f32.mxu1 %v4317_v30  ;;  %3510 = vmatprep.subr.mxu0 %v4157_v54  ;;  %v2152_v26 = vand.u32 4294901760, %v4326_v38  ;;  %v2134_v6 = vand.u32 4294901760, %v2133_v37  ;;  %v2144_v3 = vand.u32 4294901760, %v2143_v13 }
 0x21a   : > { %3545 = vmatpush3.msra.mxu1 %v4186_v21  ;;  %3470 = vmatmul.mubr.f32.gmra.mxu0 %v2124_v10 }
 0x21b   : > { %3504 = vmatmul.mubr.f32.gmra.mxu1 %v4310_v7  ;;  %3511 = vmatpush3.msra.mxu0 %v4157_v54  ;;  %v2153_v61 = vsub.f32 %v4326_v38, %v2152_v26  ;;  %v2163_v54 = vsub.f32 %v4332_v20, %v2162_v53 }
 0x21c   : > { %3546 = vmatprep.subr.mxu1 %v4200_v15  ;;  %3512 = vmatprep.subr.mxu0 %v4172_v43 }
 0x21d   : > { %3547 = vmatpush3.msra.mxu1 %v4200_v15  ;;  %3550 = vmatprep.mubr.f32.mxu1 %v2092_v5  ;;  %v2154_v24 = vand.u32 4294901760, %v2153_v61  ;;  %v2164_v32 = vand.u32 4294901760, %v2163_v54 }
 0x21e   : > { %3513 = vmatpush3.msra.mxu0 %v4172_v43  ;;  %3548 = vmatprep.subr.mxu1 %v4216_v14  ;;  %v4543_v43 = vld [vmem:[#allocation4_spill] sm:$0xff] }
 0x21f   : > { %3472 = vmatprep.mubr.f32.mxu0 %v2134_v6  ;;  %3514 = vmatprep.subr.mxu0 %v4189_v2 }
 0x220   : > { %3549 = vmatpush3.msra.mxu1 %v4216_v14  ;;  %3473 = vmatmul.mubr.f32.gmra.mxu0 %v2144_v3 }
 0x221   : > { %3515 = vmatpush3.msra.mxu0 %v4189_v2  ;;  %3551 = vmatmul.mubr.f32.vlgmr.msra.gmra.mxu1 %v2102_v46  ;;  %v4545_v2 = vld [vmem:[#allocation11_spill] sm:$0xff] }
 0x222   : > { %3590 = vmatprep.subr.mxu1 %v4123_v62  ;;  %3516 = vmatprep.subr.mxu0 %v4543_v43 }
 0x223   : > { %3553 = vmatprep.mubr.f32.mxu1 %v2112_v49  ;;  %3591 = vmatpush3.msra.mxu1 %v4123_v62  ;;  %v4546_v62 = vld [vmem:[#allocation8_spill] sm:$0xff] }
 0x224   : > { %3517 = vmatpush3.msra.mxu0 %v4543_v43  ;;  %3592 = vmatprep.subr.mxu1 %v4131_v55 }
 0x225   : > { %3475 = vmatprep.mubr.f32.mxu0 %v2154_v24  ;;  %3518 = vmatprep.subr.mxu0 %v4544_v60 }
 0x226   : > { %3593 = vmatpush3.msra.mxu1 %v4131_v55  ;;  %3476 = vmatmul.mubr.f32.gmra.mxu0 %v2164_v32  ;;  %v4547_v55 = vld [vmem:[#allocation10_spill] sm:$0xff] }
 0x227   : > { %3519 = vmatpush3.msra.mxu0 %v4544_v60  ;;  %3554 = vmatmul.mubr.f32.gmra.mxu1 %v2122_v22 }
 0x228   : > { %3594 = vmatprep.subr.mxu1 %v4144_v42  ;;  %3520 = vmatprep.subr.mxu0 %v4545_v2 }
 0x229   : > { %3522 = vmatprep.mubr.f32.mxu0 %v4262_v50  ;;  %3556 = vmatprep.mubr.f32.mxu1 %v2132_v31 }
 0x22a   : > { %3595 = vmatpush3.msra.mxu1 %v4144_v42  ;;  %3521 = vmatpush3.msra.mxu0 %v4545_v2  ;;  %v4548_v42 = vld [vmem:[#allocation2_spill] sm:$0xff] }
 0x22b   : > { %3596 = vmatprep.subr.mxu1 %v4159_v19  ;;  %3562 = vmatprep.subr.mxu0 %v4546_v62 }
 0x22c   : > { %3597 = vmatpush3.msra.mxu1 %v4159_v19  ;;  %3523 = vmatmul.mubr.f32.vlgmr.msra.gmra.mxu0 %v4254_v0  ;;  %v4549_v19 = vld [vmem:[#allocation3_spill] sm:$0xff] }
 0x22d   : > { %3557 = vmatmul.mubr.f32.gmra.mxu1 %v2142_v41  ;;  %3563 = vmatpush3.msra.mxu0 %v4546_v62 }
 0x22e   : > { %3598 = vmatprep.subr.mxu1 %v4175_v8  ;;  %3525 = vmatprep.mubr.f32.mxu0 %v4283_v33 }
 0x22f   : > { %3559 = vmatprep.mubr.f32.mxu1 %v2152_v26  ;;  %3564 = vmatprep.subr.mxu0 %v4547_v55 }
 0x230   : > { %3599 = vmatpush3.msra.mxu1 %v4175_v8  ;;  %3565 = vmatpush3.msra.mxu0 %v4547_v55  ;;  %v4550_v8 = vld [vmem:[#allocation5_spill] sm:$0xff] }
 0x231   : > { %3600 = vmatprep.subr.mxu1 %v4186_v21  ;;  %3566 = vmatprep.subr.mxu0 %v4548_v42 }
 0x232   : > { %3601 = vmatpush3.msra.mxu1 %v4186_v21  ;;  %3526 = vmatmul.mubr.f32.gmra.mxu0 %v4274_v59  ;;  %v4551_v21 = vld [vmem:[#allocation6_spill] sm:$0xff] }
 0x233   : > { %3560 = vmatmul.mubr.f32.gmra.mxu1 %v2162_v53  ;;  %3567 = vmatpush3.msra.mxu0 %v4548_v42 }
 0x234   : > { %3602 = vmatprep.subr.mxu1 %v4200_v15  ;;  %3528 = vmatprep.mubr.f32.mxu0 %v4306_v18 }
 0x235   : > { %3568 = vmatprep.subr.mxu0 %v4549_v19  ;;  %3603 = vmatpush3.msra.mxu1 %v4200_v15  ;;  %v4552_v15 = vld [vmem:[#allocation9_spill] sm:$0xff] }
 0x236   : > { %3606 = vmatprep.mubr.f32.mxu1 %v4256_v17  ;;  %3569 = vmatpush3.msra.mxu0 %v4549_v19 }
 0x237   : > { %3604 = vmatprep.subr.mxu1 %v4216_v14  ;;  %3570 = vmatprep.subr.mxu0 %v4550_v8 }
 0x238   : > { %3605 = vmatpush3.msra.mxu1 %v4216_v14  ;;  %3529 = vmatmul.mubr.f32.gmra.mxu0 %v4301_v39  ;;  %v4553_v14 = vld [vmem:[#allocation12_spill] sm:$0xff] }
 0x239   : > { %3571 = vmatpush3.msra.mxu0 %v4550_v8  ;;  %3607 = vmatmul.mubr.f32.vlgmr.msra.gmra.mxu1 %v4250_v34 }
 0x23a   : > { %3531 = vmatprep.mubr.f32.mxu0 %v4326_v38  ;;  %3572 = vmatprep.subr.mxu0 %v4551_v21 }
 0x23b   : > { %3609 = vmatprep.mubr.f32.mxu1 %v4276_v44  ;;  %3573 = vmatpush3.msra.mxu0 %v4551_v21 }
 0x23c   : > { %3574 = vmatprep.subr.mxu0 %v4552_v15  ;;  %3532 = vmatmul.mubr.f32.gmra.mxu0 %v4332_v20 }
 0x23d   : > { %3575 = vmatpush3.msra.mxu0 %v4552_v15  ;;  %3610 = vmatmul.mubr.f32.gmra.mxu1 %v4264_v51 }
 0x23e   : > { %3576 = vmatprep.subr.mxu0 %v4553_v14  ;;  %3578 = vmatprep.mubr.f32.mxu0 %v4256_v17 }
 0x23f   : > { %3612 = vmatprep.mubr.f32.mxu1 %v4296_v4  ;;  %3577 = vmatpush3.msra.mxu0 %v4553_v14 }
 0x240   : > { %3579 = vmatmul.mubr.f32.vlgmr.msra.gmra.mxu0 %v4250_v34 }
 0x241   : > { %3613 = vmatmul.mubr.f32.gmra.mxu1 %v4285_v9  ;;  %3581 = vmatprep.mubr.f32.mxu0 %v4276_v44 }
 0x242   : > { %3615 = vmatprep.mubr.f32.mxu1 %v4317_v30 }
 0x244   : > { %3582 = vmatmul.mubr.f32.gmra.mxu0 %v4264_v51 }
 0x245   : > { %3616 = vmatmul.mubr.f32.gmra.mxu1 %v4310_v7  ;;  %3584 = vmatprep.mubr.f32.mxu0 %v4296_v4  ;;  %v2931_v4 = vld [vmem:[%s4468_s6] ss:$0 sm:$0xff] }
 0x248   : > { %3585 = vmatmul.mubr.f32.gmra.mxu0 %v4285_v9 }
 0x249   : > { %3587 = vmatprep.mubr.f32.mxu0 %v4317_v30 }
 0x24c   : > { %3588 = vmatmul.mubr.f32.gmra.mxu0 %v4310_v7 }
 0x2cc   : > { %v3496_v0 = vpop.f32.mrf.mxu1 }
 0x2ce   : > { %v2277_v34 = vpop.f32.mrf.mxu1 }
 0x2d0   : > { %v3499_v17 = vpop.f32.mrf.mxu1 }
 0x2d2   : > { %v2289_v46 = vpop.f32.mrf.mxu1 }
 0x2d4   : > { %v3468_v50 = vpop.f32.mrf.mxu0 }
 0x2d5   : > { %v3502_v12 = vpop.f32.mrf.mxu1  ;;  %v2107_v39 = vadd.f32 %v3468_v50, %v2931_v4 }
 0x2d6   : > { %v2096_v63 = vpop.f32.mrf.mxu0 }
 0x2d7   : > { %v2301_v59 = vpop.f32.mrf.mxu1  ;;  %v2097_v29 = vadd.f32 %v2931_v4, %v2096_v63  ;;  %v2284_v7 = vadd.f32 %v3496_v0, %v2107_v39 }
 0x2d9   : > { %v2278_v31 = vadd.f32 %v2277_v34, %v2097_v29 }
 0x2da   : > { %v3471_v44 = vpop.f32.mrf.mxu0 }
 0x2db   : > { %v3505_v51 = vpop.f32.mrf.mxu1  ;;  %v2127_v48 = vadd.f32 %v3471_v44, %v2931_v4 }
 0x2dc   : > { %v2116_v23 = vpop.f32.mrf.mxu0 }
 0x2dd   : > { %v4421_v5 = vpop.f32.mrf.mxu1  ;;  %v2117_v30 = vadd.f32 %v2931_v4, %v2116_v23  ;;  %v2296_v10 = vadd.f32 %v3499_v17, %v2127_v48 }
 0x2df   : > { %v2290_v61 = vadd.f32 %v2289_v46, %v2117_v30 }
 0x2e0   : > { %v3474_v47 = vpop.f32.mrf.mxu0 }
 0x2e1   : > { %v3552_v1 = vpop.f32.mrf.mxu1  ;;  %v2147_v37 = vadd.f32 %v3474_v47, %v2931_v4 }
 0x2e2   : > { %v2136_v25 = vpop.f32.mrf.mxu0 }
 0x2e3   : > { %v2537_v35 = vpop.f32.mrf.mxu1  ;;  %v2137_v13 = vadd.f32 %v2931_v4, %v2136_v25  ;;  %v2308_v60 = vadd.f32 %v3502_v12, %v2147_v37 }
 0x2e5   : > { %v2302_v42 = vadd.f32 %v2301_v59, %v2137_v13 }
 0x2e6   : > { %v3477_v33 = vpop.f32.mrf.mxu0 }
 0x2e7   : > { %v3555_v11 = vpop.f32.mrf.mxu1  ;;  %v2167_v54 = vadd.f32 %v3477_v33, %v2931_v4 }
 0x2e8   : > { %v2156_v9 = vpop.f32.mrf.mxu0 }
 0x2e9   : > { %v2553_v16 = vpop.f32.mrf.mxu1  ;;  %v2157_v55 = vadd.f32 %v2931_v4, %v2156_v9  ;;  %v2320_v0 = vadd.f32 %v3505_v51, %v2167_v54 }
 0x2eb   : > { %v2314_v59 = vadd.f32 %v4421_v5, %v2157_v55 }
 0x2ec   : > { %v3524_v28 = vpop.f32.mrf.mxu0 }
 0x2ed   : > { %v3558_v40 = vpop.f32.mrf.mxu1  ;;  %v2415_v36 = vadd.f32 %v3524_v28, %v2284_v7 }
 0x2ee   : > { %v2407_v27 = vpop.f32.mrf.mxu0 }
 0x2ef   : > { %v4423_v22 = vpop.f32.mrf.mxu1  ;;  %v2408_v20 = vadd.f32 %v2407_v27, %v2278_v31  ;;  %v2546_v3 = vadd.f32 %v3552_v1, %v2415_v36 }
 0x2f1   : > { %v2538_v62 = vadd.f32 %v2537_v35, %v2408_v20 }
 0x2f2   : > { %v3527_v52 = vpop.f32.mrf.mxu0 }
 0x2f3   : > { %v4428_v49 = vpop.f32.mrf.mxu1  ;;  %v2429_v53 = vadd.f32 %v3527_v52, %v2296_v10 }
 0x2f4   : > { %v2421_v45 = vpop.f32.mrf.mxu0 }
 0x2f5   : > { %v4430_v56 = vpop.f32.mrf.mxu1  ;;  %v2422_v32 = vadd.f32 %v2421_v45, %v2290_v61  ;;  %v2562_v14 = vadd.f32 %v3555_v11, %v2429_v53 }
 0x2f7   : > { %v2554_v63 = vadd.f32 %v2553_v16, %v2422_v32 }
 0x2f8   : > { %v3530_v18 = vpop.f32.mrf.mxu0 }
 0x2f9   : > { %v3608_v57 = vpop.f32.mrf.mxu1  ;;  %v2443_v8 = vadd.f32 %v3530_v18, %v2308_v60 }
 0x2fa   : > { %v2435_v58 = vpop.f32.mrf.mxu0 }
 0x2fb   : > { %v2809_v41 = vpop.f32.mrf.mxu1  ;;  %v2436_v46 = vadd.f32 %v2435_v58, %v2302_v42  ;;  %v2578_v51 = vadd.f32 %v3558_v40, %v2443_v8 }
 0x2fc   : > { %v3533_v38 = vpop.f32.mrf.mxu0 }
 0x2fd   : > { %v3611_v26 = vpop.f32.mrf.mxu1  ;;  %v2457_v23 = vadd.f32 %v3533_v38, %v2320_v0  ;;  %v2570_v16 = vadd.f32 %v4423_v22, %v2436_v46 }
 0x2fe   : > { %v2449_v6 = vpop.f32.mrf.mxu0 }
 0x2ff   : > { %v2821_v24 = vpop.f32.mrf.mxu1  ;;  %v2450_v33 = vadd.f32 %v2449_v6, %v2314_v59  ;;  %v2594_v4 = vadd.f32 %v4428_v49, %v2457_v23 }
 0x300   : > { %v3580_v43 = vpop.f32.mrf.mxu0 }
 0x301   : > { %v2695_v2 = vadd.f32 %v3580_v43, %v2546_v3  ;;  %v3614_v34 = vpop.f32.mrf.mxu1  ;;  %v2586_v29 = vadd.f32 %v4430_v56, %v2450_v33 }
 0x302   : > { %v2688_v19 = vpop.f32.mrf.mxu0 }
 0x303   : > { %v2816_v21 = vadd.f32 %v3608_v57, %v2695_v2  ;;  %v2689_v15 = vadd.f32 %v2688_v19, %v2538_v62  ;;  %v2833_v25 = vpop.f32.mrf.mxu1 }
 0x304   : > { %v3583_v17 = vpop.f32.mrf.mxu0 }
 0x305   : > { %2857 = vst.msk [vmem:[%s4437_s12 + $0x8] sm:$0xff] %vm2855_vm2, %v2816_v21  ;;  %v2810_v50 = vadd.f32 %v2809_v41, %v2689_v15  ;;  %v2707_v12 = vadd.f32 %v3583_v17, %v2562_v14  ;;  %v3617_v40 = vpop.f32.mrf.mxu1 }
 0x306   : > { %v2700_v44 = vpop.f32.mrf.mxu0 }
 0x307   : > { %2856 = vst.msk [vmem:[%s4437_s12] sm:$0xff] %vm2855_vm2, %v2810_v50  ;;  %v2828_v47 = vadd.f32 %v3611_v26, %v2707_v12  ;;  %v2701_v1 = vadd.f32 %v2700_v44, %v2554_v63  ;;  %v2845_v7 = vpop.f32.mrf.mxu1 }
 0x308   : > { %v3586_v35 = vpop.f32.mrf.mxu0 }
 0x309   : > { %2859 = vst.msk [vmem:[%s4437_s12 + $0x18] sm:$0xff] %vm2855_vm2, %v2828_v47  ;;  %v2822_v11 = vadd.f32 %v2821_v24, %v2701_v1  ;;  %v2719_v9 = vadd.f32 %v3586_v35, %v2578_v51 }
 0x30a   : > { %v2712_v28 = vpop.f32.mrf.mxu0 }
 0x30b   : > { %2858 = vst.msk [vmem:[%s4437_s12 + $0x10] sm:$0xff] %vm2855_vm2, %v2822_v11  ;;  %v2840_v5 = vadd.f32 %v3614_v34, %v2719_v9  ;;  %v2713_v27 = vadd.f32 %v2712_v28, %v2570_v16 }
 0x30c   : > { %v3589_v52 = vpop.f32.mrf.mxu0 }
 0x30d   : > { %2861 = vst.msk [vmem:[%s4437_s12 + $0x28] sm:$0xff] %vm2855_vm2, %v2840_v5  ;;  %v2834_v45 = vadd.f32 %v2833_v25, %v2713_v27  ;;  %v2731_v39 = vadd.f32 %v3589_v52, %v2594_v4 }
 0x30e   : > { %v2724_v18 = vpop.f32.mrf.mxu0 }
 0x30f   : > { %2860 = vst.msk [vmem:[%s4437_s12 + $0x20] sm:$0xff] %vm2855_vm2, %v2834_v45  ;;  %v2852_v22 = vadd.f32 %v3617_v40, %v2731_v39  ;;  %v2725_v48 = vadd.f32 %v2724_v18, %v2586_v29 }
 0x311   : > { %2863 = vst.msk [vmem:[%s4437_s12 + $0x38] sm:$0xff] %vm2855_vm2, %v2852_v22  ;;  %v2846_v57 = vadd.f32 %v2845_v7, %v2725_v48 }
 0x313   : > { %2862 = vst.msk [vmem:[%s4437_s12 + $0x30] sm:$0xff] %vm2855_vm2, %v2846_v57 }
 0x314 PF: > { %s17_s24 = sadd.s32 1, %s3632_s24  }
 0x315   : > { %p14_p4 = scmp.ge.s32.totalorder %s17_s24, 6  }
 0x317   :  { %16 = sbr.rel (!%p14_p4) target bundleno = 1 (0x1), region = 78 }

</bundles_post_ra>
